<compile_context>
chip_gen: v7x
topology: tpu7x:2x2x1
jax: 0.10.0
libtpu: 0.0.40
codegen_flags: <defaults>
</compile_context>

<pallas_src>
import numpy as np

import jax
import jax.numpy as jnp
from jax.experimental import pallas as pl
from jax.experimental.pallas import tpu as pltpu


# ---------------------------------------------------------------------------
# Static planning of the feature extractor (conv / pool stages)
# ---------------------------------------------------------------------------
def plan_features(cfg, in_ch, hw, bt):
    """Walk cfg and emit one descriptor per conv stage (pool fused into it).

    Stage 0 uses the "dense" layout: rows = (image, y, x) of the UNPADDED map,
    fed by wrapper-side im2col (single K=9*Cin matmul).  Later stages use the
    zero-padded flat-row layout with margin rows so 9 shifted matmuls stay
    in-bounds.
    """
    H = W = hw
    C = in_ch
    stages = []
    i, n = 0, len(cfg)
    dense = True
    while i < n:
        v = cfg[i]
        # TODO(synk): BatchNorm-style cfg entries are not supported here.
        assert v != "M", "each 'M' in cfg must directly follow a conv entry"
        pool = (i + 1 < n and cfg[i + 1] == "M")
        st = dict(dense=dense, H=H, W=W, Cin=C, Cout=v, pool=pool)
        if dense:
            st["R"] = bt * H * W                       # one row per output pixel
            st["M"] = 0
        else:
            st["Hp"], st["Wp"], st["M"] = H + 2, W + 2, W + 3
            st["R"] = bt * (H + 2) * (W + 2)
        C = v
        if pool:
            assert H % 2 == 0 and W % 2 == 0, "maxpool2x2 requires even H/W"
            H //= 2
            W //= 2
            i += 2
        else:
            i += 1
        st["final"] = (i >= n)
        stages.append(st)
        dense = False
    return stages, (C, H, W)


def build_transfer(bt, st):
    """Constant 0/1 matrix: pooled (or plain) conv outputs -> next stage's
    zero-padded flat-row layout (or the (bt, C) feature matrix if final)."""
    H, W, R = st["H"], st["W"], st["R"]
    if st["dense"]:
        base = H * W

        def pos(i, j):                                  # unpadded flat offset
            return i * W + j
    else:
        Hp, Wp = st["Hp"], st["Wp"]
        base = Hp * Wp

        def pos(i, j):                                  # padded flat offset
            return (i + 1) * Wp + (j + 1)

    if st["pool"]:
        Ho, Wo = H // 2, W // 2
        P = W if st["dense"] else st["Wp"]              # row pitch used for max-shifts
        Lin = R - P - 1

        def src(b, i, j):
            return b * base + pos(2 * i, 2 * j)
    else:
        Ho, Wo = H, W
        Lin = R

        def src(b, i, j):
            return b * base + pos(i, j)

    if st["final"]:
        # TODO(synk): general final spatial >1x1 (channel-major flatten) not
        # implemented; this cfg ends at 1x1 so flatten == channel vector.
        assert Ho == 1 and Wo == 1, "classifier expects 1x1 final spatial"
        T = np.zeros((bt, Lin), np.float32)
        for b in range(bt):
            T[b, src(b, 0, 0)] = 1.0
    else:
        Hpn, Wpn, Mn = Ho + 2, Wo + 2, Wo + 3
        Rn = bt * Hpn * Wpn
        T = np.zeros((Rn + 2 * Mn, Lin), np.float32)
        for b in range(bt):
            for i in range(Ho):
                for j in range(Wo):
                    T[Mn + b * Hpn * Wpn + (i + 1) * Wpn + (j + 1),
                      src(b, i, j)] = 1.0
    return T


# ---------------------------------------------------------------------------
# Parameter init (matches _initialize_weights distributions, deterministic)
# ---------------------------------------------------------------------------
def init_params(key, cfg, in_ch, fc1, fc2, num_classes):
    convs = []
    c = in_ch
    for v in cfg:
        if v == "M":
            continue
        key, wk = jax.random.split(key)
        fan_out = v * 3 * 3                       # kaiming_normal_, fan_out, relu
        std = (2.0 / fan_out) ** 0.5
        # (ky, kx, cin, cout) -> (9*cin, cout): row block k = ky*3+kx holds W[ky,kx]
        w = jax.random.normal(wk, (3, 3, c, v), jnp.float32) * std
        convs.append((w.reshape(9 * c, v), jnp.zeros((1, v), jnp.float32)))
        c = v

    fcs = []
    for din, dout in [(512, fc1), (fc1, fc2), (fc2, num_classes)]:
        key, wk = jax.random.split(key)
        w = jax.random.normal(wk, (din, dout), jnp.float32) * 0.01   # normal(0, .01)
        fcs.append((w, jnp.zeros((1, dout), jnp.float32)))

    return {"convs": convs, "fcs": fcs}


# ---------------------------------------------------------------------------
# Fused forward pass (mirrors customizable_VGG.forward, with_latent=False)
# ---------------------------------------------------------------------------
def make_forward(cfg, in_ch, hw, fc1, fc2, num_classes, batch, bt=None):
    if bt is None:
        bt = batch if batch <= 8 else 8          # transfer matrices grow O(bt^2)
    assert batch % bt == 0, "batch must be divisible by the batch block"
    G = batch // bt

    stages, (Cf, Hf, Wf) = plan_features(cfg, in_ch, hw, bt)
    assert Cf * Hf * Wf == 512, "cfg/input must flatten to 512 (nn.Linear(512, fc1))"
    n_conv = len(stages)

    nc_pad = ((num_classes + 127) // 128) * 128          # lane-dense logits store
    transfers_np = [build_transfer(bt, st) for st in stages]
    # sanity: each transfer's output row count equals the next stage's expected
    # (R + 2*margin) flat-row count (or bt for the final flatten).
    for s in range(n_conv - 1):
        nxt = stages[s + 1]
        assert transfers_np[s].shape[0] == nxt["R"] + 2 * nxt["M"]
    assert transfers_np[-1].shape[0] == bt
    transfers = [jnp.asarray(T, jnp.bfloat16) for T in transfers_np]

    st0 = stages[0]
    R0 = st0["R"]                                         # rows of the im2col input
    K0 = 9 * in_ch                                        # im2col depth

    # ---------------- kernel (everything stays in VMEM / vregs) ----------------
    def kernel(*refs):
        x_ref = refs[0]
        cw = refs[1:1 + n_conv]
        cb = refs[1 + n_conv:1 + 2 * n_conv]
        tr = refs[1 + 2 * n_conv:1 + 3 * n_conv]
        fw = refs[1 + 3 * n_conv:4 + 3 * n_conv]
        fb = refs[4 + 3 * n_conv:7 + 3 * n_conv]
        out_ref = refs[7 + 3 * n_conv]

        z = x_ref[0]                                   # (R0, 9*Cin) bf16 im2col rows
        for s, st in enumerate(stages):
            w = cw[s][...]                             # (K, Cout) bf16
            b = cb[s][...]                             # (1, Cout) f32
            R, Cin = st["R"], st["Cin"]

            if st["dense"]:
                # conv3x3 folded into ONE matmul (wrapper-side im2col).
                acc = jnp.dot(z, w, preferred_element_type=jnp.float32)
                P = st["W"]
            else:
                # conv3x3 (same padding) = 9 shifted matmuls, f32 accumulation.
                Wp, M = st["Wp"], st["M"]
                P = Wp
                acc = None
                for k in range(9):
                    ky, kx = divmod(k, 3)
                    off = M + (ky - 1) * Wp + (kx - 1)
                    part = jnp.dot(z[off:off + R, :],
                                   w[k * Cin:(k + 1) * Cin, :],
                                   preferred_element_type=jnp.float32)
                    acc = part if acc is None else acc + part

            if st["pool"]:                             # maxpool2x2 (max of 4 shifts)
                L = R - P - 1
                acc = jnp.maximum(
                    jnp.maximum(acc[0:L], acc[1:L + 1]),
                    jnp.maximum(acc[P:P + L], acc[P + 1:P + 1 + L]))

            a = jnp.maximum(acc + b, 0.0).astype(jnp.bfloat16)   # bias + ReLU
            # constant 0/1 transfer: subsample + re-zero-pad (or final flatten).
            z = jnp.dot(tr[s][...], a,
                        preferred_element_type=jnp.float32).astype(jnp.bfloat16)

        # z: (bt, 512) bf16 features == torch.flatten(x, 1) at 1x1 spatial.
        h = z
        y = None
        for f in range(3):
            y = jnp.dot(h, fw[f][...],
                        preferred_element_type=jnp.float32) + fb[f][...]
            if f < 2:
                h = jnp.maximum(y, 0.0).astype(jnp.bfloat16)
            # TODO(synk): nn.Dropout treated as identity (eval-mode semantics).
        out_ref[...] = y                                # (bt, nc_pad) f32, lane-dense

    x_spec = pl.BlockSpec((1, R0, K0), lambda i: (i, 0, 0))
    out_spec = pl.BlockSpec((bt, nc_pad), lambda i: (i, 0))

    # ---------------- wrapper ----------------
    def forward(params, x_nchw):
        assert x_nchw.shape == (batch, in_ch, hw, hw)
        x = jnp.transpose(x_nchw, (0, 2, 3, 1))                        # NCHW -> NHWC
        xpad = jnp.pad(x, ((0, 0), (1, 1), (1, 1), (0, 0)))            # zero pad H,W
        # wrapper-side im2col for the first (narrow-channel) conv: 9 shifted
        # HxW windows concatenated on channels -> (batch, H, W, 9*Cin).
        cols = [xpad[:, ky:ky + hw, kx:kx + hw, :]
                for ky in range(3) for kx in range(3)]
        x9 = jnp.concatenate(cols, axis=-1)
        xprep = x9.reshape(G, bt * hw * hw, K0).astype(jnp.bfloat16)

        conv_ws = [w.astype(jnp.bfloat16) for (w, _) in params["convs"]]
        conv_bs = [b.astype(jnp.float32) for (_, b) in params["convs"]]
        fc_ws, fc_bs = [], []
        for f, (w, b) in enumerate(params["fcs"]):
            if f == 2:                                                 # pad logits to 128 lanes
                w = jnp.pad(w, ((0, 0), (0, nc_pad - w.shape[1])))
                b = jnp.pad(b, ((0, 0), (0, nc_pad - b.shape[1])))
            fc_ws.append(w.astype(jnp.bfloat16))
            fc_bs.append(b.astype(jnp.float32))

        operands = [xprep] + conv_ws + conv_bs + list(transfers) + fc_ws + fc_bs
        for o in operands[1:]:
            assert o.ndim == 2
        in_specs = [x_spec] + [pl.BlockSpec(o.shape, lambda i: (0, 0))
                               for o in operands[1:]]

        out = pl.pallas_call(
            kernel,
            grid=(G,),
            in_specs=in_specs,
            out_specs=out_spec,
            out_shape=jax.ShapeDtypeStruct((batch, nc_pad), jnp.float32),
            compiler_params=pltpu.CompilerParams(
                dimension_semantics=("parallel",)),
        )(*operands)
        return out[:, :num_classes]

    return forward


# ---------------------------------------------------------------------------
# Pure-JAX reference (matched bf16/f32 precision) for correctness validation
# ---------------------------------------------------------------------------
def reference_forward(params, x_nchw, cfg, in_ch):
    x = jnp.transpose(x_nchw, (0, 2, 3, 1)).astype(jnp.bfloat16)       # NHWC
    c = in_ch
    wi = 0
    i = 0
    while i < len(cfg):
        v = cfg[i]
        w, b = params["convs"][wi]
        w4 = w.reshape(3, 3, c, v).astype(jnp.bfloat16)                # HWIO
        y = jax.lax.conv_general_dilated(
            x, w4, window_strides=(1, 1), padding="SAME",
            dimension_numbers=("NHWC", "HWIO", "NHWC"),
            preferred_element_type=jnp.float32)
        y = jnp.maximum(y + b.reshape(1, 1, 1, v), 0.0)
        if i + 1 < len(cfg) and cfg[i + 1] == "M":
            y = jax.lax.reduce_window(y, -jnp.inf, jax.lax.max,
                                      (1, 2, 2, 1), (1, 2, 2, 1), "VALID")
            i += 2
        else:
            i += 1
        x = y.astype(jnp.bfloat16)
        c = v
        wi += 1
    h = x.reshape(x.shape[0], -1)                                      # (N, 512) at 1x1
    y = None
    for f, (w, b) in enumerate(params["fcs"]):
        y = jnp.dot(h, w.astype(jnp.bfloat16),
                    preferred_element_type=jnp.float32) + b
        if f < 2:
            h = jnp.maximum(y, 0.0).astype(jnp.bfloat16)
    return y


# ---------------------------------------------------------------------------
if __name__ == "__main__":
    cfg = [32, "M", 64, "M", 512, "M"]       # small VGG-style feature extractor
    fc1, fc2, num_classes = 64, 64, 16
    batch, in_ch, hw = 2, 3, 8               # 3 maxpools: 8x8 -> 1x1x512 = 512

    key = jax.random.PRNGKey(0)
    pkey, xkey = jax.random.split(key)
    params = init_params(pkey, cfg, in_ch=in_ch, fc1=fc1, fc2=fc2,
                         num_classes=num_classes)
    x = jax.random.normal(xkey, (batch, in_ch, hw, hw), jnp.float32)

    forward = jax.jit(make_forward(cfg, in_ch=in_ch, hw=hw, fc1=fc1, fc2=fc2,
                                   num_classes=num_classes, batch=batch))
    out = jax.block_until_ready(forward(params, x))

    assert out.shape == (batch, num_classes), out.shape
    assert out.dtype == jnp.float32
    assert bool(jnp.all(jnp.isfinite(out)))

    # correctness vs an independent pure-JAX implementation (same precision points)
    ref = jax.block_until_ready(reference_forward(params, x, cfg, in_ch))
    rel = float(jnp.linalg.norm(out - ref) /
                jnp.maximum(jnp.linalg.norm(ref), 1e-6))
    assert rel < 3e-2, f"relative L2 error vs reference too large: {rel}"

    print("KERNEL_OK")
</pallas_src>

<mosaic_0001>
module attributes {stable_mosaic.version = 11 : i64} {
  func.func @kernel(%arg0: i32, %arg1: memref<1x128x27xbf16, #tpu.memory_space<vmem>>, %arg2: memref<27x32xbf16, #tpu.memory_space<vmem>>, %arg3: memref<288x64xbf16, #tpu.memory_space<vmem>>, %arg4: memref<576x512xbf16, #tpu.memory_space<vmem>>, %arg5: memref<1x32xf32, #tpu.memory_space<vmem>>, %arg6: memref<1x64xf32, #tpu.memory_space<vmem>>, %arg7: memref<1x512xf32, #tpu.memory_space<vmem>>, %arg8: memref<86x119xbf16, #tpu.memory_space<vmem>>, %arg9: memref<42x65xbf16, #tpu.memory_space<vmem>>, %arg10: memref<2x27xbf16, #tpu.memory_space<vmem>>, %arg11: memref<512x64xbf16, #tpu.memory_space<vmem>>, %arg12: memref<64x64xbf16, #tpu.memory_space<vmem>>, %arg13: memref<64x128xbf16, #tpu.memory_space<vmem>>, %arg14: memref<1x64xf32, #tpu.memory_space<vmem>>, %arg15: memref<1x64xf32, #tpu.memory_space<vmem>>, %arg16: memref<1x128xf32, #tpu.memory_space<vmem>>, %arg17: memref<2x128xf32, #tpu.memory_space<vmem>>) attributes {dimension_semantics = [#tpu.dimension_semantics<parallel>], iteration_bounds = array<i64: 1>, scalar_prefetch = 0 : i64, scratch_operands = 0 : i64, tpu.core_type = #tpu.core_type<tc>, window_params = [{transform_indices = @transform_0, window_bounds = array<i64: 1, 128, 27>}, {pipeline_mode = #tpu.pipeline_mode<synchronous>, transform_indices = @transform_1, window_bounds = array<i64: 27, 32>}, {pipeline_mode = #tpu.pipeline_mode<synchronous>, transform_indices = @transform_2, window_bounds = array<i64: 288, 64>}, {pipeline_mode = #tpu.pipeline_mode<synchronous>, transform_indices = @transform_3, window_bounds = array<i64: 576, 512>}, {pipeline_mode = #tpu.pipeline_mode<synchronous>, transform_indices = @transform_4, window_bounds = array<i64: 1, 32>}, {pipeline_mode = #tpu.pipeline_mode<synchronous>, transform_indices = @transform_5, window_bounds = array<i64: 1, 64>}, {pipeline_mode = #tpu.pipeline_mode<synchronous>, transform_indices = @transform_6, window_bounds = array<i64: 1, 512>}, {pipeline_mode = #tpu.pipeline_mode<synchronous>, transform_indices = @transform_7, window_bounds = array<i64: 86, 119>}, {pipeline_mode = #tpu.pipeline_mode<synchronous>, transform_indices = @transform_8, window_bounds = array<i64: 42, 65>}, {pipeline_mode = #tpu.pipeline_mode<synchronous>, transform_indices = @transform_9, window_bounds = array<i64: 2, 27>}, {pipeline_mode = #tpu.pipeline_mode<synchronous>, transform_indices = @transform_10, window_bounds = array<i64: 512, 64>}, {pipeline_mode = #tpu.pipeline_mode<synchronous>, transform_indices = @transform_11, window_bounds = array<i64: 64, 64>}, {pipeline_mode = #tpu.pipeline_mode<synchronous>, transform_indices = @transform_12, window_bounds = array<i64: 64, 128>}, {pipeline_mode = #tpu.pipeline_mode<synchronous>, transform_indices = @transform_13, window_bounds = array<i64: 1, 64>}, {pipeline_mode = #tpu.pipeline_mode<synchronous>, transform_indices = @transform_14, window_bounds = array<i64: 1, 64>}, {pipeline_mode = #tpu.pipeline_mode<synchronous>, transform_indices = @transform_15, window_bounds = array<i64: 1, 128>}, {transform_indices = @transform_16, window_bounds = array<i64: 2, 128>}]} {
    %c0 = arith.constant 0 : index
    %c0_0 = arith.constant 0 : index
    %c0_1 = arith.constant 0 : index
    %0 = vector.load %arg1[%c0, %c0_0, %c0_1] : memref<1x128x27xbf16, #tpu.memory_space<vmem>>, vector<1x128x27xbf16>
    %1 = vector.shape_cast %0 : vector<1x128x27xbf16> to vector<128x27xbf16>
    %c0_2 = arith.constant 0 : index
    %c0_3 = arith.constant 0 : index
    %2 = vector.load %arg2[%c0_2, %c0_3] : memref<27x32xbf16, #tpu.memory_space<vmem>>, vector<27x32xbf16>
    %c0_4 = arith.constant 0 : index
    %c0_5 = arith.constant 0 : index
    %3 = vector.load %arg5[%c0_4, %c0_5] : memref<1x32xf32, #tpu.memory_space<vmem>>, vector<1x32xf32>
    %cst = arith.constant dense<0.000000e+00> : vector<128x32xf32>
    %4 = tpu.matmul %1, %2, %cst {dimension_numbers = #tpu.dot_dimension_numbers<[1], [0], [0], [1], [0, 0, 1, 1], [], []>} : vector<128x27xbf16>, vector<27x32xbf16>, vector<128x32xf32> -> vector<128x32xf32>
    %5 = vector.extract_strided_slice %4 {offsets = [0, 0], sizes = [119, 32], strides = [1, 1]} : vector<128x32xf32> to vector<119x32xf32>
    %6 = vector.extract_strided_slice %4 {offsets = [1, 0], sizes = [119, 32], strides = [1, 1]} : vector<128x32xf32> to vector<119x32xf32>
    %7 = arith.maximumf %5, %6 : vector<119x32xf32>
    %8 = vector.extract_strided_slice %4 {offsets = [8, 0], sizes = [119, 32], strides = [1, 1]} : vector<128x32xf32> to vector<119x32xf32>
    %9 = vector.extract_strided_slice %4 {offsets = [9, 0], sizes = [119, 32], strides = [1, 1]} : vector<128x32xf32> to vector<119x32xf32>
    %10 = arith.maximumf %8, %9 : vector<119x32xf32>
    %11 = arith.maximumf %7, %10 : vector<119x32xf32>
    %12 = vector.broadcast %3 : vector<1x32xf32> to vector<119x32xf32>
    %13 = arith.addf %11, %12 : vector<119x32xf32>
    %cst_6 = arith.constant 0.000000e+00 : f32
    %14 = vector.broadcast %cst_6 : f32 to vector<119x32xf32>
    %15 = arith.maximumf %13, %14 : vector<119x32xf32>
    %16 = arith.truncf %15 : vector<119x32xf32> to vector<119x32xbf16>
    %c0_7 = arith.constant 0 : index
    %c0_8 = arith.constant 0 : index
    %17 = vector.load %arg8[%c0_7, %c0_8] : memref<86x119xbf16, #tpu.memory_space<vmem>>, vector<86x119xbf16>
    %cst_9 = arith.constant dense<0.000000e+00> : vector<86x32xf32>
    %18 = tpu.matmul %17, %16, %cst_9 {dimension_numbers = #tpu.dot_dimension_numbers<[1], [0], [0], [1], [0, 0, 1, 1], [], []>} : vector<86x119xbf16>, vector<119x32xbf16>, vector<86x32xf32> -> vector<86x32xf32>
    %19 = arith.truncf %18 : vector<86x32xf32> to vector<86x32xbf16>
    %c0_10 = arith.constant 0 : index
    %c0_11 = arith.constant 0 : index
    %20 = vector.load %arg3[%c0_10, %c0_11] : memref<288x64xbf16, #tpu.memory_space<vmem>>, vector<288x64xbf16>
    %c0_12 = arith.constant 0 : index
    %c0_13 = arith.constant 0 : index
    %21 = vector.load %arg6[%c0_12, %c0_13] : memref<1x64xf32, #tpu.memory_space<vmem>>, vector<1x64xf32>
    %22 = vector.extract_strided_slice %19 {offsets = [0, 0], sizes = [72, 32], strides = [1, 1]} : vector<86x32xbf16> to vector<72x32xbf16>
    %23 = vector.extract_strided_slice %20 {offsets = [0, 0], sizes = [32, 64], strides = [1, 1]} : vector<288x64xbf16> to vector<32x64xbf16>
    %cst_14 = arith.constant dense<0.000000e+00> : vector<72x64xf32>
    %24 = tpu.matmul %22, %23, %cst_14 {dimension_numbers = #tpu.dot_dimension_numbers<[1], [0], [0], [1], [0, 0, 1, 1], [], []>} : vector<72x32xbf16>, vector<32x64xbf16>, vector<72x64xf32> -> vector<72x64xf32>
    %25 = vector.extract_strided_slice %19 {offsets = [1, 0], sizes = [72, 32], strides = [1, 1]} : vector<86x32xbf16> to vector<72x32xbf16>
    %26 = vector.extract_strided_slice %20 {offsets = [32, 0], sizes = [32, 64], strides = [1, 1]} : vector<288x64xbf16> to vector<32x64xbf16>
    %cst_15 = arith.constant dense<0.000000e+00> : vector<72x64xf32>
    %27 = tpu.matmul %25, %26, %cst_15 {dimension_numbers = #tpu.dot_dimension_numbers<[1], [0], [0], [1], [0, 0, 1, 1], [], []>} : vector<72x32xbf16>, vector<32x64xbf16>, vector<72x64xf32> -> vector<72x64xf32>
    %28 = arith.addf %24, %27 : vector<72x64xf32>
    %29 = vector.extract_strided_slice %19 {offsets = [2, 0], sizes = [72, 32], strides = [1, 1]} : vector<86x32xbf16> to vector<72x32xbf16>
    %30 = vector.extract_strided_slice %20 {offsets = [64, 0], sizes = [32, 64], strides = [1, 1]} : vector<288x64xbf16> to vector<32x64xbf16>
    %cst_16 = arith.constant dense<0.000000e+00> : vector<72x64xf32>
    %31 = tpu.matmul %29, %30, %cst_16 {dimension_numbers = #tpu.dot_dimension_numbers<[1], [0], [0], [1], [0, 0, 1, 1], [], []>} : vector<72x32xbf16>, vector<32x64xbf16>, vector<72x64xf32> -> vector<72x64xf32>
    %32 = arith.addf %28, %31 : vector<72x64xf32>
    %33 = vector.extract_strided_slice %19 {offsets = [6, 0], sizes = [72, 32], strides = [1, 1]} : vector<86x32xbf16> to vector<72x32xbf16>
    %34 = vector.extract_strided_slice %20 {offsets = [96, 0], sizes = [32, 64], strides = [1, 1]} : vector<288x64xbf16> to vector<32x64xbf16>
    %cst_17 = arith.constant dense<0.000000e+00> : vector<72x64xf32>
    %35 = tpu.matmul %33, %34, %cst_17 {dimension_numbers = #tpu.dot_dimension_numbers<[1], [0], [0], [1], [0, 0, 1, 1], [], []>} : vector<72x32xbf16>, vector<32x64xbf16>, vector<72x64xf32> -> vector<72x64xf32>
    %36 = arith.addf %32, %35 : vector<72x64xf32>
    %37 = vector.extract_strided_slice %19 {offsets = [7, 0], sizes = [72, 32], strides = [1, 1]} : vector<86x32xbf16> to vector<72x32xbf16>
    %38 = vector.extract_strided_slice %20 {offsets = [128, 0], sizes = [32, 64], strides = [1, 1]} : vector<288x64xbf16> to vector<32x64xbf16>
    %cst_18 = arith.constant dense<0.000000e+00> : vector<72x64xf32>
    %39 = tpu.matmul %37, %38, %cst_18 {dimension_numbers = #tpu.dot_dimension_numbers<[1], [0], [0], [1], [0, 0, 1, 1], [], []>} : vector<72x32xbf16>, vector<32x64xbf16>, vector<72x64xf32> -> vector<72x64xf32>
    %40 = arith.addf %36, %39 : vector<72x64xf32>
    %41 = vector.extract_strided_slice %19 {offsets = [8, 0], sizes = [72, 32], strides = [1, 1]} : vector<86x32xbf16> to vector<72x32xbf16>
    %42 = vector.extract_strided_slice %20 {offsets = [160, 0], sizes = [32, 64], strides = [1, 1]} : vector<288x64xbf16> to vector<32x64xbf16>
    %cst_19 = arith.constant dense<0.000000e+00> : vector<72x64xf32>
    %43 = tpu.matmul %41, %42, %cst_19 {dimension_numbers = #tpu.dot_dimension_numbers<[1], [0], [0], [1], [0, 0, 1, 1], [], []>} : vector<72x32xbf16>, vector<32x64xbf16>, vector<72x64xf32> -> vector<72x64xf32>
    %44 = arith.addf %40, %43 : vector<72x64xf32>
    %45 = vector.extract_strided_slice %19 {offsets = [12, 0], sizes = [72, 32], strides = [1, 1]} : vector<86x32xbf16> to vector<72x32xbf16>
    %46 = vector.extract_strided_slice %20 {offsets = [192, 0], sizes = [32, 64], strides = [1, 1]} : vector<288x64xbf16> to vector<32x64xbf16>
    %cst_20 = arith.constant dense<0.000000e+00> : vector<72x64xf32>
    %47 = tpu.matmul %45, %46, %cst_20 {dimension_numbers = #tpu.dot_dimension_numbers<[1], [0], [0], [1], [0, 0, 1, 1], [], []>} : vector<72x32xbf16>, vector<32x64xbf16>, vector<72x64xf32> -> vector<72x64xf32>
    %48 = arith.addf %44, %47 : vector<72x64xf32>
    %49 = vector.extract_strided_slice %19 {offsets = [13, 0], sizes = [72, 32], strides = [1, 1]} : vector<86x32xbf16> to vector<72x32xbf16>
    %50 = vector.extract_strided_slice %20 {offsets = [224, 0], sizes = [32, 64], strides = [1, 1]} : vector<288x64xbf16> to vector<32x64xbf16>
    %cst_21 = arith.constant dense<0.000000e+00> : vector<72x64xf32>
    %51 = tpu.matmul %49, %50, %cst_21 {dimension_numbers = #tpu.dot_dimension_numbers<[1], [0], [0], [1], [0, 0, 1, 1], [], []>} : vector<72x32xbf16>, vector<32x64xbf16>, vector<72x64xf32> -> vector<72x64xf32>
    %52 = arith.addf %48, %51 : vector<72x64xf32>
    %53 = vector.extract_strided_slice %19 {offsets = [14, 0], sizes = [72, 32], strides = [1, 1]} : vector<86x32xbf16> to vector<72x32xbf16>
    %54 = vector.extract_strided_slice %20 {offsets = [256, 0], sizes = [32, 64], strides = [1, 1]} : vector<288x64xbf16> to vector<32x64xbf16>
    %cst_22 = arith.constant dense<0.000000e+00> : vector<72x64xf32>
    %55 = tpu.matmul %53, %54, %cst_22 {dimension_numbers = #tpu.dot_dimension_numbers<[1], [0], [0], [1], [0, 0, 1, 1], [], []>} : vector<72x32xbf16>, vector<32x64xbf16>, vector<72x64xf32> -> vector<72x64xf32>
    %56 = arith.addf %52, %55 : vector<72x64xf32>
    %57 = vector.extract_strided_slice %56 {offsets = [0, 0], sizes = [65, 64], strides = [1, 1]} : vector<72x64xf32> to vector<65x64xf32>
    %58 = vector.extract_strided_slice %56 {offsets = [1, 0], sizes = [65, 64], strides = [1, 1]} : vector<72x64xf32> to vector<65x64xf32>
    %59 = arith.maximumf %57, %58 : vector<65x64xf32>
    %60 = vector.extract_strided_slice %56 {offsets = [6, 0], sizes = [65, 64], strides = [1, 1]} : vector<72x64xf32> to vector<65x64xf32>
    %61 = vector.extract_strided_slice %56 {offsets = [7, 0], sizes = [65, 64], strides = [1, 1]} : vector<72x64xf32> to vector<65x64xf32>
    %62 = arith.maximumf %60, %61 : vector<65x64xf32>
    %63 = arith.maximumf %59, %62 : vector<65x64xf32>
    %64 = vector.broadcast %21 : vector<1x64xf32> to vector<65x64xf32>
    %65 = arith.addf %63, %64 : vector<65x64xf32>
    %cst_23 = arith.constant 0.000000e+00 : f32
    %66 = vector.broadcast %cst_23 : f32 to vector<65x64xf32>
    %67 = arith.maximumf %65, %66 : vector<65x64xf32>
    %68 = arith.truncf %67 : vector<65x64xf32> to vector<65x64xbf16>
    %c0_24 = arith.constant 0 : index
    %c0_25 = arith.constant 0 : index
    %69 = vector.load %arg9[%c0_24, %c0_25] : memref<42x65xbf16, #tpu.memory_space<vmem>>, vector<42x65xbf16>
    %cst_26 = arith.constant dense<0.000000e+00> : vector<42x64xf32>
    %70 = tpu.matmul %69, %68, %cst_26 {dimension_numbers = #tpu.dot_dimension_numbers<[1], [0], [0], [1], [0, 0, 1, 1], [], []>} : vector<42x65xbf16>, vector<65x64xbf16>, vector<42x64xf32> -> vector<42x64xf32>
    %71 = arith.truncf %70 : vector<42x64xf32> to vector<42x64xbf16>
    %c0_27 = arith.constant 0 : index
    %c0_28 = arith.constant 0 : index
    %72 = vector.load %arg4[%c0_27, %c0_28] : memref<576x512xbf16, #tpu.memory_space<vmem>>, vector<576x512xbf16>
    %c0_29 = arith.constant 0 : index
    %c0_30 = arith.constant 0 : index
    %73 = vector.load %arg7[%c0_29, %c0_30] : memref<1x512xf32, #tpu.memory_space<vmem>>, vector<1x512xf32>
    %74 = vector.extract_strided_slice %71 {offsets = [0, 0], sizes = [32, 64], strides = [1, 1]} : vector<42x64xbf16> to vector<32x64xbf16>
    %75 = vector.extract_strided_slice %72 {offsets = [0, 0], sizes = [64, 512], strides = [1, 1]} : vector<576x512xbf16> to vector<64x512xbf16>
    %cst_31 = arith.constant dense<0.000000e+00> : vector<32x512xf32>
    %76 = tpu.matmul %74, %75, %cst_31 {dimension_numbers = #tpu.dot_dimension_numbers<[1], [0], [0], [1], [0, 0, 1, 1], [], []>} : vector<32x64xbf16>, vector<64x512xbf16>, vector<32x512xf32> -> vector<32x512xf32>
    %77 = vector.extract_strided_slice %71 {offsets = [1, 0], sizes = [32, 64], strides = [1, 1]} : vector<42x64xbf16> to vector<32x64xbf16>
    %78 = vector.extract_strided_slice %72 {offsets = [64, 0], sizes = [64, 512], strides = [1, 1]} : vector<576x512xbf16> to vector<64x512xbf16>
    %cst_32 = arith.constant dense<0.000000e+00> : vector<32x512xf32>
    %79 = tpu.matmul %77, %78, %cst_32 {dimension_numbers = #tpu.dot_dimension_numbers<[1], [0], [0], [1], [0, 0, 1, 1], [], []>} : vector<32x64xbf16>, vector<64x512xbf16>, vector<32x512xf32> -> vector<32x512xf32>
    %80 = arith.addf %76, %79 : vector<32x512xf32>
    %81 = vector.extract_strided_slice %71 {offsets = [2, 0], sizes = [32, 64], strides = [1, 1]} : vector<42x64xbf16> to vector<32x64xbf16>
    %82 = vector.extract_strided_slice %72 {offsets = [128, 0], sizes = [64, 512], strides = [1, 1]} : vector<576x512xbf16> to vector<64x512xbf16>
    %cst_33 = arith.constant dense<0.000000e+00> : vector<32x512xf32>
    %83 = tpu.matmul %81, %82, %cst_33 {dimension_numbers = #tpu.dot_dimension_numbers<[1], [0], [0], [1], [0, 0, 1, 1], [], []>} : vector<32x64xbf16>, vector<64x512xbf16>, vector<32x512xf32> -> vector<32x512xf32>
    %84 = arith.addf %80, %83 : vector<32x512xf32>
    %85 = vector.extract_strided_slice %71 {offsets = [4, 0], sizes = [32, 64], strides = [1, 1]} : vector<42x64xbf16> to vector<32x64xbf16>
    %86 = vector.extract_strided_slice %72 {offsets = [192, 0], sizes = [64, 512], strides = [1, 1]} : vector<576x512xbf16> to vector<64x512xbf16>
    %cst_34 = arith.constant dense<0.000000e+00> : vector<32x512xf32>
    %87 = tpu.matmul %85, %86, %cst_34 {dimension_numbers = #tpu.dot_dimension_numbers<[1], [0], [0], [1], [0, 0, 1, 1], [], []>} : vector<32x64xbf16>, vector<64x512xbf16>, vector<32x512xf32> -> vector<32x512xf32>
    %88 = arith.addf %84, %87 : vector<32x512xf32>
    %89 = vector.extract_strided_slice %71 {offsets = [5, 0], sizes = [32, 64], strides = [1, 1]} : vector<42x64xbf16> to vector<32x64xbf16>
    %90 = vector.extract_strided_slice %72 {offsets = [256, 0], sizes = [64, 512], strides = [1, 1]} : vector<576x512xbf16> to vector<64x512xbf16>
    %cst_35 = arith.constant dense<0.000000e+00> : vector<32x512xf32>
    %91 = tpu.matmul %89, %90, %cst_35 {dimension_numbers = #tpu.dot_dimension_numbers<[1], [0], [0], [1], [0, 0, 1, 1], [], []>} : vector<32x64xbf16>, vector<64x512xbf16>, vector<32x512xf32> -> vector<32x512xf32>
    %92 = arith.addf %88, %91 : vector<32x512xf32>
    %93 = vector.extract_strided_slice %71 {offsets = [6, 0], sizes = [32, 64], strides = [1, 1]} : vector<42x64xbf16> to vector<32x64xbf16>
    %94 = vector.extract_strided_slice %72 {offsets = [320, 0], sizes = [64, 512], strides = [1, 1]} : vector<576x512xbf16> to vector<64x512xbf16>
    %cst_36 = arith.constant dense<0.000000e+00> : vector<32x512xf32>
    %95 = tpu.matmul %93, %94, %cst_36 {dimension_numbers = #tpu.dot_dimension_numbers<[1], [0], [0], [1], [0, 0, 1, 1], [], []>} : vector<32x64xbf16>, vector<64x512xbf16>, vector<32x512xf32> -> vector<32x512xf32>
    %96 = arith.addf %92, %95 : vector<32x512xf32>
    %97 = vector.extract_strided_slice %71 {offsets = [8, 0], sizes = [32, 64], strides = [1, 1]} : vector<42x64xbf16> to vector<32x64xbf16>
    %98 = vector.extract_strided_slice %72 {offsets = [384, 0], sizes = [64, 512], strides = [1, 1]} : vector<576x512xbf16> to vector<64x512xbf16>
    %cst_37 = arith.constant dense<0.000000e+00> : vector<32x512xf32>
    %99 = tpu.matmul %97, %98, %cst_37 {dimension_numbers = #tpu.dot_dimension_numbers<[1], [0], [0], [1], [0, 0, 1, 1], [], []>} : vector<32x64xbf16>, vector<64x512xbf16>, vector<32x512xf32> -> vector<32x512xf32>
    %100 = arith.addf %96, %99 : vector<32x512xf32>
    %101 = vector.extract_strided_slice %71 {offsets = [9, 0], sizes = [32, 64], strides = [1, 1]} : vector<42x64xbf16> to vector<32x64xbf16>
    %102 = vector.extract_strided_slice %72 {offsets = [448, 0], sizes = [64, 512], strides = [1, 1]} : vector<576x512xbf16> to vector<64x512xbf16>
    %cst_38 = arith.constant dense<0.000000e+00> : vector<32x512xf32>
    %103 = tpu.matmul %101, %102, %cst_38 {dimension_numbers = #tpu.dot_dimension_numbers<[1], [0], [0], [1], [0, 0, 1, 1], [], []>} : vector<32x64xbf16>, vector<64x512xbf16>, vector<32x512xf32> -> vector<32x512xf32>
    %104 = arith.addf %100, %103 : vector<32x512xf32>
    %105 = vector.extract_strided_slice %71 {offsets = [10, 0], sizes = [32, 64], strides = [1, 1]} : vector<42x64xbf16> to vector<32x64xbf16>
    %106 = vector.extract_strided_slice %72 {offsets = [512, 0], sizes = [64, 512], strides = [1, 1]} : vector<576x512xbf16> to vector<64x512xbf16>
    %cst_39 = arith.constant dense<0.000000e+00> : vector<32x512xf32>
    %107 = tpu.matmul %105, %106, %cst_39 {dimension_numbers = #tpu.dot_dimension_numbers<[1], [0], [0], [1], [0, 0, 1, 1], [], []>} : vector<32x64xbf16>, vector<64x512xbf16>, vector<32x512xf32> -> vector<32x512xf32>
    %108 = arith.addf %104, %107 : vector<32x512xf32>
    %109 = vector.extract_strided_slice %108 {offsets = [0, 0], sizes = [27, 512], strides = [1, 1]} : vector<32x512xf32> to vector<27x512xf32>
    %110 = vector.extract_strided_slice %108 {offsets = [1, 0], sizes = [27, 512], strides = [1, 1]} : vector<32x512xf32> to vector<27x512xf32>
    %111 = arith.maximumf %109, %110 : vector<27x512xf32>
    %112 = vector.extract_strided_slice %108 {offsets = [4, 0], sizes = [27, 512], strides = [1, 1]} : vector<32x512xf32> to vector<27x512xf32>
    %113 = vector.extract_strided_slice %108 {offsets = [5, 0], sizes = [27, 512], strides = [1, 1]} : vector<32x512xf32> to vector<27x512xf32>
    %114 = arith.maximumf %112, %113 : vector<27x512xf32>
    %115 = arith.maximumf %111, %114 : vector<27x512xf32>
    %116 = vector.broadcast %73 : vector<1x512xf32> to vector<27x512xf32>
    %117 = arith.addf %115, %116 : vector<27x512xf32>
    %cst_40 = arith.constant 0.000000e+00 : f32
    %118 = vector.broadcast %cst_40 : f32 to vector<27x512xf32>
    %119 = arith.maximumf %117, %118 : vector<27x512xf32>
    %120 = arith.truncf %119 : vector<27x512xf32> to vector<27x512xbf16>
    %c0_41 = arith.constant 0 : index
    %c0_42 = arith.constant 0 : index
    %121 = vector.load %arg10[%c0_41, %c0_42] : memref<2x27xbf16, #tpu.memory_space<vmem>>, vector<2x27xbf16>
    %cst_43 = arith.constant dense<0.000000e+00> : vector<2x512xf32>
    %122 = tpu.matmul %121, %120, %cst_43 {dimension_numbers = #tpu.dot_dimension_numbers<[1], [0], [0], [1], [0, 0, 1, 1], [], []>} : vector<2x27xbf16>, vector<27x512xbf16>, vector<2x512xf32> -> vector<2x512xf32>
    %123 = arith.truncf %122 : vector<2x512xf32> to vector<2x512xbf16>
    %c0_44 = arith.constant 0 : index
    %c0_45 = arith.constant 0 : index
    %124 = vector.load %arg11[%c0_44, %c0_45] : memref<512x64xbf16, #tpu.memory_space<vmem>>, vector<512x64xbf16>
    %cst_46 = arith.constant dense<0.000000e+00> : vector<2x64xf32>
    %125 = tpu.matmul %123, %124, %cst_46 {dimension_numbers = #tpu.dot_dimension_numbers<[1], [0], [0], [1], [0, 0, 1, 1], [], []>} : vector<2x512xbf16>, vector<512x64xbf16>, vector<2x64xf32> -> vector<2x64xf32>
    %c0_47 = arith.constant 0 : index
    %c0_48 = arith.constant 0 : index
    %126 = vector.load %arg14[%c0_47, %c0_48] : memref<1x64xf32, #tpu.memory_space<vmem>>, vector<1x64xf32>
    %127 = vector.broadcast %126 : vector<1x64xf32> to vector<2x64xf32>
    %128 = arith.addf %125, %127 : vector<2x64xf32>
    %cst_49 = arith.constant 0.000000e+00 : f32
    %129 = vector.broadcast %cst_49 : f32 to vector<2x64xf32>
    %130 = arith.maximumf %128, %129 : vector<2x64xf32>
    %131 = arith.truncf %130 : vector<2x64xf32> to vector<2x64xbf16>
    %c0_50 = arith.constant 0 : index
    %c0_51 = arith.constant 0 : index
    %132 = vector.load %arg12[%c0_50, %c0_51] : memref<64x64xbf16, #tpu.memory_space<vmem>>, vector<64x64xbf16>
    %cst_52 = arith.constant dense<0.000000e+00> : vector<2x64xf32>
    %133 = tpu.matmul %131, %132, %cst_52 {dimension_numbers = #tpu.dot_dimension_numbers<[1], [0], [0], [1], [0, 0, 1, 1], [], []>} : vector<2x64xbf16>, vector<64x64xbf16>, vector<2x64xf32> -> vector<2x64xf32>
    %c0_53 = arith.constant 0 : index
    %c0_54 = arith.constant 0 : index
    %134 = vector.load %arg15[%c0_53, %c0_54] : memref<1x64xf32, #tpu.memory_space<vmem>>, vector<1x64xf32>
    %135 = vector.broadcast %134 : vector<1x64xf32> to vector<2x64xf32>
    %136 = arith.addf %133, %135 : vector<2x64xf32>
    %cst_55 = arith.constant 0.000000e+00 : f32
    %137 = vector.broadcast %cst_55 : f32 to vector<2x64xf32>
    %138 = arith.maximumf %136, %137 : vector<2x64xf32>
    %139 = arith.truncf %138 : vector<2x64xf32> to vector<2x64xbf16>
    %c0_56 = arith.constant 0 : index
    %c0_57 = arith.constant 0 : index
    %140 = vector.load %arg13[%c0_56, %c0_57] : memref<64x128xbf16, #tpu.memory_space<vmem>>, vector<64x128xbf16>
    %cst_58 = arith.constant dense<0.000000e+00> : vector<2x128xf32>
    %141 = tpu.matmul %139, %140, %cst_58 {dimension_numbers = #tpu.dot_dimension_numbers<[1], [0], [0], [1], [0, 0, 1, 1], [], []>} : vector<2x64xbf16>, vector<64x128xbf16>, vector<2x128xf32> -> vector<2x128xf32>
    %c0_59 = arith.constant 0 : index
    %c0_60 = arith.constant 0 : index
    %142 = vector.load %arg16[%c0_59, %c0_60] : memref<1x128xf32, #tpu.memory_space<vmem>>, vector<1x128xf32>
    %143 = vector.broadcast %142 : vector<1x128xf32> to vector<2x128xf32>
    %144 = arith.addf %141, %143 : vector<2x128xf32>
    %c0_61 = arith.constant 0 : index
    %c0_62 = arith.constant 0 : index
    %145 = vector.load %arg17[%c0_61, %c0_62] : memref<2x128xf32, #tpu.memory_space<vmem>>, vector<2x128xf32>
    tpu.vector_store %arg17[%c0_61, %c0_62], %144 {strides = array<i32>} : memref<2x128xf32, #tpu.memory_space<vmem>>, vector<2x128xf32>,
    return
  }
  func.func @transform_0(%arg0: i32) -> (i32, i32, i32) {
    %c0_i32 = arith.constant 0 : i32
    %c0_i32_0 = arith.constant 0 : i32
    %c0_i32_1 = arith.constant 0 : i32
    return %arg0, %c0_i32, %c0_i32_0 : i32, i32, i32
  }
  func.func @transform_1(%arg0: i32) -> (i32, i32) {
    %c0_i32 = arith.constant 0 : i32
    %c0_i32_0 = arith.constant 0 : i32
    %c0_i32_1 = arith.constant 0 : i32
    return %c0_i32, %c0_i32_0 : i32, i32
  }
  func.func @transform_2(%arg0: i32) -> (i32, i32) {
    %c0_i32 = arith.constant 0 : i32
    %c0_i32_0 = arith.constant 0 : i32
    %c0_i32_1 = arith.constant 0 : i32
    return %c0_i32, %c0_i32_0 : i32, i32
  }
  func.func @transform_3(%arg0: i32) -> (i32, i32) {
    %c0_i32 = arith.constant 0 : i32
    %c0_i32_0 = arith.constant 0 : i32
    %c0_i32_1 = arith.constant 0 : i32
    return %c0_i32, %c0_i32_0 : i32, i32
  }
  func.func @transform_4(%arg0: i32) -> (i32, i32) {
    %c0_i32 = arith.constant 0 : i32
    %c0_i32_0 = arith.constant 0 : i32
    %c0_i32_1 = arith.constant 0 : i32
    return %c0_i32, %c0_i32_0 : i32, i32
  }
  func.func @transform_5(%arg0: i32) -> (i32, i32) {
    %c0_i32 = arith.constant 0 : i32
    %c0_i32_0 = arith.constant 0 : i32
    %c0_i32_1 = arith.constant 0 : i32
    return %c0_i32, %c0_i32_0 : i32, i32
  }
  func.func @transform_6(%arg0: i32) -> (i32, i32) {
    %c0_i32 = arith.constant 0 : i32
    %c0_i32_0 = arith.constant 0 : i32
    %c0_i32_1 = arith.constant 0 : i32
    return %c0_i32, %c0_i32_0 : i32, i32
  }
  func.func @transform_7(%arg0: i32) -> (i32, i32) {
    %c0_i32 = arith.constant 0 : i32
    %c0_i32_0 = arith.constant 0 : i32
    %c0_i32_1 = arith.constant 0 : i32
    return %c0_i32, %c0_i32_0 : i32, i32
  }
  func.func @transform_8(%arg0: i32) -> (i32, i32) {
    %c0_i32 = arith.constant 0 : i32
    %c0_i32_0 = arith.constant 0 : i32
    %c0_i32_1 = arith.constant 0 : i32
    return %c0_i32, %c0_i32_0 : i32, i32
  }
  func.func @transform_9(%arg0: i32) -> (i32, i32) {
    %c0_i32 = arith.constant 0 : i32
    %c0_i32_0 = arith.constant 0 : i32
    %c0_i32_1 = arith.constant 0 : i32
    return %c0_i32, %c0_i32_0 : i32, i32
  }
  func.func @transform_10(%arg0: i32) -> (i32, i32) {
    %c0_i32 = arith.constant 0 : i32
    %c0_i32_0 = arith.constant 0 : i32
    %c0_i32_1 = arith.constant 0 : i32
    return %c0_i32, %c0_i32_0 : i32, i32
  }
  func.func @transform_11(%arg0: i32) -> (i32, i32) {
    %c0_i32 = arith.constant 0 : i32
    %c0_i32_0 = arith.constant 0 : i32
    %c0_i32_1 = arith.constant 0 : i32
    return %c0_i32, %c0_i32_0 : i32, i32
  }
  func.func @transform_12(%arg0: i32) -> (i32, i32) {
    %c0_i32 = arith.constant 0 : i32
    %c0_i32_0 = arith.constant 0 : i32
    %c0_i32_1 = arith.constant 0 : i32
    return %c0_i32, %c0_i32_0 : i32, i32
  }
  func.func @transform_13(%arg0: i32) -> (i32, i32) {
    %c0_i32 = arith.constant 0 : i32
    %c0_i32_0 = arith.constant 0 : i32
    %c0_i32_1 = arith.constant 0 : i32
    return %c0_i32, %c0_i32_0 : i32, i32
  }
  func.func @transform_14(%arg0: i32) -> (i32, i32) {
    %c0_i32 = arith.constant 0 : i32
    %c0_i32_0 = arith.constant 0 : i32
    %c0_i32_1 = arith.constant 0 : i32
    return %c0_i32, %c0_i32_0 : i32, i32
  }
  func.func @transform_15(%arg0: i32) -> (i32, i32) {
    %c0_i32 = arith.constant 0 : i32
    %c0_i32_0 = arith.constant 0 : i32
    %c0_i32_1 = arith.constant 0 : i32
    return %c0_i32, %c0_i32_0 : i32, i32
  }
  func.func @transform_16(%arg0: i32) -> (i32, i32) {
    %c0_i32 = arith.constant 0 : i32
    %c0_i32_0 = arith.constant 0 : i32
    return %arg0, %c0_i32 : i32, i32
  }
}

</mosaic_0001>

<bundles_post_ra>
// kernel: forward.1
= control target key start
LH: loop header
LB: loop body
LE: loop exit
PB: predicated region body
PF: predicated region fallthrough
CT: control target
= control target key end

     0   :  { %s7755_s0 = inlined_call_operand.vmem [shape: bf16[1,128,27], index: 0, kind: input, shape index: {}]   ;;  %s7756_s1 = inlined_call_operand.vmem [shape: bf16[27,32], index: 1, kind: input, shape index: {}]   ;;  %s7757_s2 = inlined_call_operand.vmem [shape: bf16[288,64], index: 2, kind: input, shape index: {}]   ;;  %s7758_s3 = inlined_call_operand.vmem [shape: bf16[576,512], index: 3, kind: input, shape index: {}]   ;;  %s7759_s4 = inlined_call_operand.vmem [shape: f32[1,32], index: 4, kind: input, shape index: {}]   ;;  %s7760_s5 = inlined_call_operand.vmem [shape: f32[1,64], index: 5, kind: input, shape index: {}]   ;;  %s7761_s6 = inlined_call_operand.vmem [shape: f32[1,512], index: 6, kind: input, shape index: {}]   ;;  %s7762_s7 = inlined_call_operand.vmem [shape: bf16[86,119], index: 7, kind: input, shape index: {}]   ;;  %s7763_s8 = inlined_call_operand.vmem [shape: bf16[42,65], index: 8, kind: input, shape index: {}]   ;;  %s7764_s9 = inlined_call_operand.vmem [shape: bf16[2,27], index: 9, kind: input, shape index: {}]   ;;  %s7765_s10 = inlined_call_operand.vmem [shape: bf16[512,64], index: 10, kind: input, shape index: {}]   ;;  %s7766_s11 = inlined_call_operand.vmem [shape: bf16[64,64], index: 11, kind: input, shape index: {}]   ;;  %s7767_s12 = inlined_call_operand.vmem [shape: bf16[64,128], index: 12, kind: input, shape index: {}]   ;;  %s7768_s13 = inlined_call_operand.vmem [shape: f32[1,64], index: 13, kind: input, shape index: {}]   ;;  %s7769_s14 = inlined_call_operand.vmem [shape: f32[1,64], index: 14, kind: input, shape index: {}]   ;;  %s7770_s15 = inlined_call_operand.vmem [shape: f32[1,128], index: 15, kind: input, shape index: {}]   ;;  %s7771_s16 = inlined_call_operand.hbm [shape: f32[2,128], index: 16, kind: output, shape index: {}]  }
   0x1   :  { %7773 = sst [smem:[#allocation5_spill]] %s7755_s0 }
   0x2   :  { %v5880_v0 = vld [vmem:[%s7756_s1] sm:$0xff]   ;;  %vm152_vm0 = vcmask 1044480   ;;  %v5881_v1 = vld [vmem:[%s7756_s1 + $0x8] sm:$0x3f]   ;;  %vm153_vm1 = vcmask 1045504   ;;  %v6197_v2 = vmov 65535  }
   0x3   :  { %5277 = vmatprep.subr.bf16.mxu0 %v5880_v0  ;;  %v154_v3 = vsel %vm152_vm0, 4294967295, %v6197_v2  ;;  %s7774_s27 = sld [smem:[#allocation5_spill]]  ;;  %vm127_vm2 = vcmask 220160  }
   0x4   :  { %5278 = vmatpush3.bf16.msra.mxu0 %v5880_v0  ;;  %v6299_v5 = vsel %vm153_vm1, %v154_v3, 0 }
   0x5   :  { %v157_v6 = vand.u32 %v5881_v1, %v6299_v5 }
   0x7   :  { %5279 = vmatprep.subr.bf16.mxu0 %v157_v6 }
   0x8   :  { %5280 = vmatpush3.bf16.msra.mxu0 %v157_v6 }
   0x9   :  { %v5882_v4 = vld [vmem:[%s7774_s27] sm:$0xff]   ;;  %v5883_v7 = vld [vmem:[%s7774_s27 + $0x8] sm:$0xff]   ;;  %v5884_v8 = vld [vmem:[%s7774_s27 + $0x10] sm:$0xff]  }
   0xa   :  { %5281 = vmatprep.mubr.msk.bf16.mxu0 %vm127_vm2, %v5882_v4  ;;  %v5885_v9 = vld [vmem:[%s7774_s27 + $0x18] sm:$0xff]   ;;  %v5886_v10 = vld [vmem:[%s7774_s27 + $0x20] sm:$0xff]   ;;  %v5887_v11 = vld [vmem:[%s7774_s27 + $0x28] sm:$0xff]  }
   0xb   :  { %5282 = vmatmul.mubr.msk.bf16.vlgmr.msra.gmra.mrb[0].mxu0 %vm127_vm2, %v5883_v7  ;;  %v5888_v12 = vld [vmem:[%s7774_s27 + $0x30] sm:$0xff]   ;;  %v5889_v13 = vld [vmem:[%s7774_s27 + $0x38] sm:$0xff]  }
   0xc   :  { %5285 = vmatprep.mubr.msk.bf16.mxu0 %vm127_vm2, %v5884_v8 }
  0x13   :  { %5286 = vmatmul.mubr.msk.bf16.gmra.mrb[4].mxu0 %vm127_vm2, %v5885_v9 }
  0x14   :  { %5289 = vmatprep.mubr.msk.bf16.mxu0 %vm127_vm2, %v5886_v10 }
  0x1b   :  { %5290 = vmatmul.mubr.msk.bf16.gmra.mrb[8].mxu0 %vm127_vm2, %v5887_v11 }
  0x1c   :  { %5293 = vmatprep.mubr.msk.bf16.mxu0 %vm127_vm2, %v5888_v12 }
  0x23   :  { %5294 = vmatmul.mubr.msk.bf16.gmra.mrb[12].mxu0 %vm127_vm2, %v5889_v13 }
  0x24   :  { %21 = vsyncpa [#allocation3], 0  ;;  %v5890_v14 = vld [vmem:[%s7762_s7] sm:$0xff]   ;;  %vm436_vm3 = vcmask 973824   ;;  %v5896_v15 = vld [vmem:[%s7757_s2 + $0x10] sm:$0xff]   ;;  %v6198_v16 = vmov 0.0  }
  0x25   :  { %5313 = vmatprep.mubr.msk.bf16.mxu1 %vm436_vm3, %v5890_v14  ;;  %5325 = vmatprep.subr.bf16.mxu0 %v6198_v16  ;;  %v5897_v17 = vld [vmem:[%s7757_s2 + $0x18] sm:$0xff]   ;;  %vm271_vm4 = vcmask 1046528   ;;  %v6350_v33 = vld [vmem:[%s7759_s4] ss:$0 sm:$0xff]  ;;  %vm455_vm5 = vcmask 1042432   ;;  %vm456_vm6 = vcmask 1043456  }
  0x26   :  { %5326 = vmatpush3.bf16.msra.mxu0 %v5896_v15  ;;  %vm6199_vm7 = vmmov 0   ;;  %vm585_vm8 = vsmask.f32 7424  ;;  %vm637_vm9 = vcmask 261120   ;;  %vm1060_vm10 = vsmask.f32 4352 }
  0x27   :  { %5327 = vmatprep.subr.bf16.mxu0 %v6198_v16  ;;  %5329 = vmatprep.mubr.msk.bf16.mxu0 %vm6199_vm7, %v6198_v16  ;;  %vm1307_vm11 = vcmask 1041408   ;;  %vm1427_vm12 = vsmask.f32 1280  ;;  %vm1564_vm13 = vcmask 1040384   ;;  %vm1823_vm14 = vcmask 531456  }
  0x28   :  { %vm2144_vm15 = vcmask 523264  }
  0x2a   :  { %5328 = vmatpush3.bf16.msra.mxu0 %v5897_v17 }
  0x2b   :  { %5349 = vmatprep.subr.bf16.mxu0 %v6198_v16 }
  0xde   :  { %v5283_v18 = vpop.f32.mrb[0].mxu0 }
  0xdf   :  { %v193_v19 = vpop.f32.mrb[1].mxu0  ;;  %v275_v21 = vrot.slane %v5283_v18, 1 }
  0xe0   :  { %v5284_v20 = vpop.f32.mrb[2].mxu0  ;;  %v272_v24 = vrot.slane %v193_v19, 1 }
  0xe1   :  { %v277_v22 = vrot.slane %v5284_v20, 1  ;;  %v196_v23 = vpop.f32.mrb[3].mxu0 }
  0xe2   :  { %v273_v25 = vrot.slane %v196_v23, 1 }
  0xe3   :  { %v278_v26 = vsel %vm271_vm4, %v275_v21, %v277_v22 }
  0xe4   :  { %v274_v27 = vsel %vm271_vm4, %v272_v24, %v273_v25  ;;  %v276_v28 = vsel %vm271_vm4, %v273_v25, %v275_v21  ;;  %v318_v29 = vmax.f32 %v5283_v18, %v278_v26 }
  0xe5   :  { %v316_v30 = vmax.f32 %v193_v19, %v274_v27  ;;  %v317_v31 = vmax.f32 %v196_v23, %v276_v28 }
  0xe6   :  { %v5287_v32 = vpop.f32.mrb[4].mxu0 }
  0xe7   :  { %v338_v34 = vmax.f32 %v316_v30, %v317_v31  ;;  %v339_v35 = vmax.f32 %v317_v31, %v318_v29  ;;  %v209_v36 = vpop.f32.mrb[5].mxu0  ;;  %v283_v39 = vrot.slane %v5287_v32, 1 }
  0xe8   :  { %v279_v37 = vrot.slane %v209_v36, 1  ;;  %v5288_v38 = vpop.f32.mrb[6].mxu0 }
  0xe9   :  { %v285_v40 = vrot.slane %v5288_v38, 1  ;;  %v212_v41 = vpop.f32.mrb[7].mxu0  ;;  %v359_v42 = vadd.f32 %v6350_v33, %v338_v34  ;;  %v360_v43 = vadd.f32 %v6350_v33, %v339_v35 }
  0xea   :  { %v280_v44 = vsel %vm271_vm4, %v277_v22, %v279_v37  ;;  %v281_v45 = vrot.slane %v212_v41, 1 }
  0xeb   :  { %v319_v46 = vmax.f32 %v5284_v20, %v280_v44  ;;  %v286_v47 = vsel %vm271_vm4, %v283_v39, %v285_v40  ;;  %v374_v48 = vmax.f32 %v359_v42, 0.0  ;;  %v375_v49 = vmax.f32 %v360_v43, 0.0 }
  0xec   :  { %v282_v50 = vsel %vm271_vm4, %v279_v37, %v281_v45  ;;  %v284_v51 = vsel %vm271_vm4, %v281_v45, %v283_v39  ;;  %v322_v52 = vmax.f32 %v5287_v32, %v286_v47 }
  0xed   :  { %v320_v53 = vmax.f32 %v209_v36, %v282_v50  ;;  %v321_v54 = vmax.f32 %v212_v41, %v284_v51  ;;  %v389_v55 = vpack.c.bf16 %v375_v49, %v374_v48  ;;  %v340_v56 = vmax.f32 %v318_v29, %v319_v46 }
  0xee   :  { %v5291_v57 = vpop.f32.mrb[8].mxu0 }
  0xef   :  { %v341_v58 = vmax.f32 %v319_v46, %v320_v53  ;;  %v342_v59 = vmax.f32 %v320_v53, %v321_v54  ;;  %v343_v60 = vmax.f32 %v321_v54, %v322_v52  ;;  %v225_v61 = vpop.f32.mrb[9].mxu0  ;;  %5297 = vmatprep.subr.bf16.mxu1 %v389_v55  ;;  %v291_v62 = vrot.slane %v5291_v57, 1 }
  0xf0   :  { %v287_v63 = vrot.slane %v225_v61, 1  ;;  %v5292_v0 = vpop.f32.mrb[10].mxu0  ;;  %5298 = vmatpush3.bf16.msra.mxu1 %v389_v55  ;;  %v361_v1 = vadd.f32 %v6350_v33, %v340_v56 }
  0xf1   :  { %v363_v3 = vadd.f32 %v6350_v33, %v342_v59  ;;  %v364_v4 = vadd.f32 %v6350_v33, %v343_v60  ;;  %v293_v6 = vrot.slane %v5292_v0, 1  ;;  %v228_v7 = vpop.f32.mrb[11].mxu0  ;;  %v362_v8 = vadd.f32 %v6350_v33, %v341_v58 }
  0xf2   :  { %v288_v9 = vsel %vm271_vm4, %v285_v40, %v287_v63  ;;  %v289_v10 = vrot.slane %v228_v7, 1  ;;  %v376_v11 = vmax.f32 %v361_v1, 0.0 }
  0xf3   :  { %v323_v12 = vmax.f32 %v5288_v38, %v288_v9  ;;  %v294_v13 = vsel %vm271_vm4, %v291_v62, %v293_v6  ;;  %v377_v14 = vmax.f32 %v362_v8, 0.0  ;;  %v378_v15 = vmax.f32 %v363_v3, 0.0 }
  0xf4   :  { %v290_v17 = vsel %vm271_vm4, %v287_v63, %v289_v10  ;;  %v292_v18 = vsel %vm271_vm4, %v289_v10, %v291_v62  ;;  %v326_v19 = vmax.f32 %v5291_v57, %v294_v13  ;;  %v379_v20 = vmax.f32 %v364_v4, 0.0 }
  0xf5   :  { %v324_v21 = vmax.f32 %v225_v61, %v290_v17  ;;  %v325_v22 = vmax.f32 %v228_v7, %v292_v18  ;;  %v390_v23 = vpack.c.bf16 %v377_v14, %v376_v11  ;;  %v344_v24 = vmax.f32 %v322_v52, %v323_v12  ;;  %v5891_v17 = vld [vmem:[%s7762_s7 + $0x8] sm:$0xff]   ;;  %v5892_v18 = vld [vmem:[%s7762_s7 + $0x10] sm:$0xff]  }
  0xf6   :  { %v5295_v25 = vpop.f32.mrb[12].mxu0  ;;  %v391_v26 = vpack.c.bf16 %v379_v20, %v378_v15  ;;  %v457_v13 = vsel %vm455_vm5, 4294967295, %v6197_v2  ;;  %v5893_v2 = vld [vmem:[%s7762_s7 + $0x18] sm:$0xff]   ;;  %v5895_v20 = vld [vmem:[%s7762_s7 + $0x28] ss:$0 sps:$4 sm:$0x77]  }
  0xf7   :  { %v345_v27 = vmax.f32 %v323_v12, %v324_v21  ;;  %v346_v28 = vmax.f32 %v324_v21, %v325_v22  ;;  %v347_v29 = vmax.f32 %v325_v22, %v326_v19  ;;  %v299_v30 = vrot.slane %v5295_v25, 1  ;;  %v241_v31 = vpop.f32.mrb[13].mxu0  ;;  %5299 = vmatprep.subr.bf16.mxu1 %v390_v23 }
  0xf8   :  { %v295_v32 = vrot.slane %v241_v31, 1  ;;  %v5296_v34 = vpop.f32.mrb[14].mxu0  ;;  %5300 = vmatpush3.bf16.msra.mxu1 %v390_v23  ;;  %v365_v35 = vadd.f32 %v6350_v33, %v344_v24  ;;  %v458_v15 = vsel %vm456_vm6, %v457_v13, 0 }
  0xf9   :  { %v367_v36 = vadd.f32 %v6350_v33, %v346_v28  ;;  %v368_v37 = vadd.f32 %v6350_v33, %v347_v29  ;;  %v330_v38 = vmax.f32 %v5295_v25, %v299_v30  ;;  %v332_v39 = vrot.slane %v5296_v34, 1  ;;  %v244_v40 = vpop.f32.mrb[15].mxu0  ;;  %5301 = vmatprep.subr.bf16.mxu1 %v391_v26 }
  0xfa   :  { %v296_v41 = vsel %vm271_vm4, %v293_v6, %v295_v32  ;;  %v297_v42 = vrot.slane %v244_v40, 1  ;;  %v366_v43 = vadd.f32 %v6350_v33, %v345_v27  ;;  %v380_v44 = vmax.f32 %v365_v35, 0.0 }
  0xfb   :  { %v327_v45 = vmax.f32 %v5292_v0, %v296_v41  ;;  %v333_v46 = vsel %vm271_vm4, %v299_v30, %v332_v39  ;;  %v337_v47 = vmax.f32 %v5296_v34, %v332_v39  ;;  %v382_v48 = vmax.f32 %v367_v36, 0.0 }
  0xfc   :  { %v298_v49 = vsel %vm271_vm4, %v295_v32, %v297_v42  ;;  %v300_v50 = vsel %vm271_vm4, %v297_v42, %v299_v30  ;;  %v336_v51 = vmax.f32 %v5295_v25, %v333_v46  ;;  %5302 = vmatpush3.bf16.msra.mxu1 %v391_v26  ;;  %v381_v52 = vmax.f32 %v366_v43, 0.0 }
  0xfd   :  { %v352_v53 = vmax.f32 %v330_v38, %v337_v47  ;;  %v328_v54 = vmax.f32 %v241_v31, %v298_v49  ;;  %v329_v55 = vmax.f32 %v244_v40, %v300_v50  ;;  %v383_v56 = vmax.f32 %v368_v37, 0.0 }
  0xfe   :  { %v392_v57 = vpack.c.bf16 %v381_v52, %v380_v44  ;;  %v348_v58 = vmax.f32 %v326_v19, %v327_v45  ;;  %v5894_v19 = vld [vmem:[%s7762_s7 + $0x20] sm:$0xff]  }
  0xff   :  { %v349_v59 = vmax.f32 %v327_v45, %v328_v54  ;;  %v350_v60 = vmax.f32 %v328_v54, %v329_v55  ;;  %v351_v61 = vmax.f32 %v329_v55, %v336_v51  ;;  %v373_v62 = vadd.f32 %v6350_v33, %v352_v53  ;;  %v5898_v51 = vld [vmem:[%s7757_s2] sm:$0xff]  }
 0x100   :  { %5303 = vmatprep.subr.bf16.mxu1 %v392_v57  ;;  %v393_v63 = vpack.c.bf16 %v383_v56, %v382_v48  ;;  %v369_v0 = vadd.f32 %v6350_v33, %v348_v58 }
 0x101   :  { %v371_v1 = vadd.f32 %v6350_v33, %v350_v60  ;;  %v372_v3 = vadd.f32 %v6350_v33, %v351_v61  ;;  %5304 = vmatpush3.bf16.msra.mxu1 %v392_v57  ;;  %v370_v4 = vadd.f32 %v6350_v33, %v349_v59  ;;  %v388_v10 = vmax.f32 %v373_v62, 0.0 }
 0x102   :  { %5305 = vmatprep.subr.bf16.mxu1 %v393_v63  ;;  %v384_v6 = vmax.f32 %v369_v0, 0.0 }
 0x103   :  { %v385_v7 = vmax.f32 %v370_v4, 0.0  ;;  %v386_v8 = vmax.f32 %v371_v1, 0.0  ;;  %v387_v9 = vmax.f32 %v372_v3, 0.0  ;;  %v396_v14 = vpack.c.bf16 %v388_v10, %v388_v10 }
 0x105   :  { %5306 = vmatpush3.bf16.msra.mxu1 %v393_v63  ;;  %v394_v11 = vpack.c.bf16 %v385_v7, %v384_v6  ;;  %v395_v12 = vpack.c.bf16 %v387_v9, %v386_v8  ;;  %v460_v33 = vand.u32 %v458_v15, %v396_v14  ;;  %v5899_v8 = vld [vmem:[%s7757_s2 + $0x8] sm:$0xff]  }
 0x107   :  { %5307 = vmatprep.subr.bf16.mxu1 %v394_v11 }
 0x109   :  { %5308 = vmatpush3.bf16.msra.mxu1 %v394_v11 }
 0x10a   :  { %5309 = vmatprep.subr.bf16.mxu1 %v395_v12 }
 0x10d   :  { %5310 = vmatpush3.bf16.msra.mxu1 %v395_v12 }
 0x10e   :  { %5311 = vmatprep.subr.bf16.mxu1 %v460_v33 }
 0x111   :  { %5312 = vmatpush3.bf16.msra.mxu1 %v460_v33 }
 0x112   :  { %5541 = vmatprep.subr.bf16.mxu1 %v6198_v16 }
 0x114   :  { %5314 = vmatmul.mubr.msk.bf16.vlgmr.msra.gmra.mrb[0].mxu1 %vm436_vm3, %v5891_v17 }
 0x115   :  { %5317 = vmatprep.mubr.msk.bf16.mxu1 %vm436_vm3, %v5892_v18 }
 0x11c   :  { %5318 = vmatmul.mubr.msk.bf16.gmra.mrb[4].mxu1 %vm436_vm3, %v5893_v2 }
 0x11d   :  { %5321 = vmatprep.mubr.msk.bf16.mxu1 %vm436_vm3, %v5894_v19 }
 0x124   :  { %5322 = vmatmul.mubr.msk.bf16.gmra.mrb[8].mxu1 %vm436_vm3, %v5895_v20  ;;  %vm2877_vm3 = vsmask.f32 5376 }
 0x125   :  { %5551 = vmatprep.mubr.msk.bf16.mxu1 %vm6199_vm7, %v6198_v16 }
 0x1e7   :  { %v5315_v21 = vpop.f32.mrb[0].mxu1 }
 0x1e8   :  { %v496_v22 = vpop.f32.mrb[1].mxu1 }
 0x1e9   :  { %v5316_v23 = vpop.f32.mrb[2].mxu1 }
 0x1ea   :  { %v6407_v24 = vpack.c.bf16 %v5316_v23, %v5315_v21  ;;  %v499_v25 = vpop.f32.mrb[3].mxu1 }
 0x1eb   :  { %v6409_v26 = vpack.c.bf16 %v499_v25, %v496_v22 }
 0x1ec   :  { %v6412_v27 = vshll.u32 %v6407_v24, 16  ;;  %v6415_v28 = vshrl.u32 %v6407_v24, 16  ;;  %v826_v29 = vrot.slane %v6407_v24, 1  ;;  %v944_v30 = vrot.slane %v6407_v24, 3 }
 0x1ed   :  { %v6420_v31 = vshrl.u32 %v6409_v26, 16  ;;  %v6423_v32 = vshll.u32 %v6409_v26, 16  ;;  %v825_v34 = vrot.slane %v6409_v26, 1  ;;  %v943_v35 = vrot.slane %v6409_v26, 3 }
 0x1ee   :  { %v596_v36 = vrot.slane %v6412_v27, 1  ;;  %v1064_v37 = vrot.slane %v6415_v28, 3  ;;  %v1065_v38 = vrot.slane %v6412_v27, 4  ;;  %v1189_v39 = vrot.slane %v6409_v26, 4 }
 0x1ef   :  { %v5319_v40 = vpop.f32.mrb[4].mxu1  ;;  %v591_v41 = vrot.slane %v6423_v32, 1  ;;  %v6433_v42 = vsel %vm271_vm4, %v825_v34, %v826_v29  ;;  %v6436_v43 = vsel %vm152_vm0, %v943_v35, %v944_v30  ;;  %v1061_v44 = vrot.slane %v6420_v31, 3 }
 0x1f0   :  { %v512_v45 = vpop.f32.mrb[5].mxu1  ;;  %v1062_v46 = vrot.slane %v6423_v32, 4  ;;  %v6440_v47 = vor.u32 %v1065_v38, %v1064_v37  ;;  %v1190_v48 = vrot.slane %v6407_v24, 4  ;;  %v600_v52 = vor.u32 %v6415_v28, %v596_v36 }
 0x1f1   :  { %v5320_v49 = vpop.f32.mrb[6].mxu1  ;;  %v592_v50 = vor.u32 %v591_v41, %v6420_v31  ;;  %v1308_v53 = vrot.slane %v6409_v26, 6  ;;  %v1309_v54 = vrot.slane %v6407_v24, 6  ;;  %v1428_v59 = vrot.slane %v6420_v31, 6 }
 0x1f2   :  { %v6450_v55 = vpack.c.bf16 %v5320_v49, %v5319_v40  ;;  %v515_v56 = vpop.f32.mrb[7].mxu1  ;;  %v1063_v57 = vor.u32 %v1062_v46, %v1061_v44  ;;  %v6455_v58 = vsel %vm456_vm6, %v1189_v39, %v1190_v48  ;;  %v1429_v63 = vrot.slane %v6423_v32, 7 }
 0x1f3   :  { %v6458_v60 = vpack.c.bf16 %v515_v56, %v512_v45  ;;  %v597_v61 = vsel %vm585_vm8, %v592_v50, %v596_v36  ;;  %v6464_v62 = vsel %vm1307_vm11, %v1308_v53, %v1309_v54  ;;  %v1431_v23 = vrot.slane %v6415_v28, 6 }
 0x1f4   :  { %5330 = vmatmul.mubr.msk.bf16.vlgmr.msra.gmra.mrb[16].mxu0 %vm637_vm9, %v597_v61  ;;  %v6469_v0 = vshll.u32 %v6450_v55, 16  ;;  %v6472_v1 = vshrl.u32 %v6450_v55, 16  ;;  %v830_v3 = vrot.slane %v6450_v55, 1  ;;  %v948_v4 = vrot.slane %v6450_v55, 3 }
 0x1f5   :  { %5350 = vmatpush3.bf16.msra.mxu0 %v5898_v51  ;;  %5333 = vmatprep.mubr.msk.bf16.mxu0 %vm6199_vm7, %v6198_v16  ;;  %v6479_v6 = vshll.u32 %v6458_v60, 16  ;;  %v6482_v7 = vshrl.u32 %v6458_v60, 16  ;;  %v828_v9 = vrot.slane %v6458_v60, 1  ;;  %v946_v10 = vrot.slane %v6458_v60, 3 }
 0x1f6   :  { %v612_v11 = vrot.slane %v6469_v0, 1  ;;  %5351 = vmatprep.subr.bf16.mxu0 %v6198_v16  ;;  %v6493_v12 = vsel %vm1060_vm10, %v1063_v57, %v6440_v47  ;;  %v1072_v13 = vrot.slane %v6472_v1, 3  ;;  %v1073_v14 = vrot.slane %v6469_v0, 4 }
 0x1f7   :  { %v5323_v15 = vpop.f32.mrb[8].mxu1  ;;  %v604_v33 = vrot.slane %v6479_v6, 1  ;;  %v6499_v17 = vsel %vm271_vm4, %v826_v29, %v828_v9  ;;  %v6502_v18 = vsel %vm271_vm4, %v828_v9, %v830_v3  ;;  %v6505_v2 = vsel %vm152_vm0, %v944_v30, %v946_v10 }
 0x1f8   :  { %v6507_v19 = vpack.c.bf16 %v5323_v15, %v5323_v15  ;;  %v528_v20 = vpop.f32.mrb[9].mxu1  ;;  %v6510_v21 = vsel %vm152_vm0, %v946_v10, %v948_v4  ;;  %v1068_v22 = vrot.slane %v6482_v7, 3  ;;  %v1069_v35 = vrot.slane %v6479_v6, 4 }
 0x1f9   :  { %v5324_v25 = vpop.f32.mrb[10].mxu1  ;;  %v605_v29 = vsel %vm585_vm8, %v600_v52, %v604_v33  ;;  %v608_v34 = vor.u32 %v6482_v7, %v604_v33  ;;  %5352 = vmatpush3.bf16.msra.mxu0 %v5899_v8  ;;  %v1074_v30 = vor.u32 %v1073_v14, %v1072_v13  ;;  %v616_v38 = vor.u32 %v6472_v1, %v612_v11 }
 0x1fa   :  { %v1448_v36 = vshrl.u32 %v6507_v19, 16  ;;  %v531_v37 = vpop.f32.mrb[11].mxu1  ;;  %5373 = vmatprep.subr.bf16.mxu0 %v6198_v16  ;;  %v1192_v39 = vrot.slane %v6458_v60, 4  ;;  %v1194_v28 = vrot.slane %v6450_v55, 4  ;;  %v1070_v44 = vor.u32 %v1069_v35, %v1068_v22 }
 0x1fb   :  { %v6522_v40 = vpack.c.bf16 %v531_v37, %v528_v20  ;;  %v613_v41 = vsel %vm585_vm8, %v608_v34, %v612_v11  ;;  %v1311_v45 = vrot.slane %v6458_v60, 6  ;;  %v1451_v49 = vshll.u32 %v6507_v19, 16 }
 0x1fc   :  { %v1450_v46 = vrot.slane %v1448_v36, 6  ;;  %5334 = vmatmul.mubr.msk.bf16.gmra.mrb[20].mxu0 %vm637_vm9, %v605_v29  ;;  %v6531_v50 = vsel %vm456_vm6, %v1190_v48, %v1192_v39  ;;  %v6534_v51 = vsel %vm456_vm6, %v1192_v39, %v1194_v28  ;;  %v6544_v61 = vsel %vm1060_vm10, %v6440_v47, %v1070_v44 }
 0x1fd   :  { %5337 = vmatprep.mubr.msk.bf16.mxu0 %vm6199_vm7, %v6198_v16  ;;  %v618_v52 = vshll.u32 %v6522_v40, 16  ;;  %v622_v53 = vshrl.u32 %v6522_v40, 16  ;;  %v832_v56 = vrot.slane %v6522_v40, 1  ;;  %v950_v57 = vrot.slane %v6522_v40, 3 }
 0x1fe   :  { %v6547_v48 = vsel %vm1060_vm10, %v1070_v44, %v1074_v30  ;;  %v1196_v8 = vrot.slane %v6522_v40, 4  ;;  %v6553_v9 = vsel %vm1307_vm11, %v1309_v54, %v1311_v45  ;;  %v1313_v54 = vrot.slane %v6450_v55, 6 }
 0x1ff   :  { %v620_v10 = vrot.slane %v618_v52, 1  ;;  %v6558_v11 = vsel %vm271_vm4, %v830_v3, %v832_v56  ;;  %v6563_v47 = vsel %vm152_vm0, %v948_v4, %v950_v57  ;;  %v1076_v13 = vrot.slane %v622_v53, 3 }
 0x200   :  { %v1077_v14 = vrot.slane %v618_v52, 4  ;;  %v6568_v15 = vsel %vm456_vm6, %v1194_v28, %v1196_v8  ;;  %v1315_v33 = vrot.slane %v6522_v40, 6  ;;  %v1453_v20 = vrot.slane %v1451_v49, 7 }
 0x201   :  { %v621_v3 = vsel %vm585_vm8, %v616_v38, %v620_v10  ;;  %v1317_v22 = vrot.slane %v6507_v19, 6  ;;  %v1430_v4 = vor.u32 %v1429_v63, %v1428_v59  ;;  %v6581_v29 = vsel %vm1307_vm11, %v1311_v45, %v1313_v54 }
 0x202   :  { %v6578_v25 = vor.u32 %v1077_v14, %v1076_v13  ;;  %v6584_v34 = vsel %vm1307_vm11, %v1313_v54, %v1315_v33  ;;  %v1432_v35 = vrot.slane %v6412_v27, 7  ;;  %v1435_v37 = vrot.slane %v6482_v7, 6 }
 0x203   :  { %v6588_v36 = vsel %vm1307_vm11, %v1315_v33, %v1317_v22  ;;  %v1436_v31 = vrot.slane %v6479_v6, 7  ;;  %v1439_v32 = vrot.slane %v6472_v1, 6  ;;  %v1440_v38 = vrot.slane %v6469_v0, 7 }
 0x204   :  { %5338 = vmatmul.mubr.msk.bf16.gmra.mrb[24].mxu0 %vm637_vm9, %v613_v41  ;;  %v6596_v59 = vsel %vm1060_vm10, %v1074_v30, %v6578_v25  ;;  %v1433_v63 = vor.u32 %v1432_v35, %v1431_v23  ;;  %v1443_v39 = vrot.slane %v622_v53, 6  ;;  %v1444_v28 = vrot.slane %v618_v52, 7  ;;  %v5900_v35 = vld [vmem:[%s7757_s2 + $0x20] sm:$0xff]  }
 0x205   :  { %5341 = vmatprep.mubr.msk.bf16.mxu0 %vm6199_vm7, %v6198_v16  ;;  %v1437_v27 = vor.u32 %v1436_v31, %v1435_v37  ;;  %v1454_v7 = vor.u32 %v1453_v20, %v1450_v46  ;;  %v1565_v6 = vrot.slane %v6409_v26, 7  ;;  %v1441_v41 = vor.u32 %v1440_v38, %v1439_v32 }
 0x206   :  { %v6603_v1 = vsel %vm1427_vm12, %v1430_v4, %v1433_v63  ;;  %v1566_v44 = vrot.slane %v6407_v24, 7  ;;  %v1568_v30 = vrot.slane %v6458_v60, 7  ;;  %v1445_v0 = vor.u32 %v1444_v28, %v1443_v39 }
 0x207   :  { %v6608_v23 = vsel %vm1427_vm12, %v1433_v63, %v1437_v27  ;;  %v1570_v45 = vrot.slane %v6450_v55, 7  ;;  %v1572_v49 = vrot.slane %v6522_v40, 7  ;;  %v6613_v46 = vsel %vm1427_vm12, %v1437_v27, %v1441_v41 }
 0x208   :  { %v6616_v52 = vsel %vm1564_vm13, %v1565_v6, %v1566_v44  ;;  %v6619_v13 = vsel %vm1564_vm13, %v1566_v44, %v1568_v30  ;;  %v1574_v14 = vrot.slane %v6507_v19, 7  ;;  %v6623_v54 = vsel %vm1427_vm12, %v1441_v41, %v1445_v0 }
 0x209   :  { %v6626_v33 = vsel %vm1427_vm12, %v1445_v0, %v1454_v7  ;;  %v6629_v20 = vsel %vm1564_vm13, %v1568_v30, %v1570_v45  ;;  %v6632_v22 = vsel %vm1564_vm13, %v1570_v45, %v1572_v49  ;;  %v624_v19 = vor.u32 %v622_v53, %v620_v10  ;;  %v5901_v53 = vld [vmem:[%s7757_s2 + $0x28] sm:$0xff]  }
 0x20a   :  { %v6635_v4 = vsel %vm1564_vm13, %v1572_v49, %v1574_v14 }
 0x20c   :  { %5342 = vmatmul.mubr.msk.bf16.gmra.mrb[28].mxu0 %vm637_vm9, %v621_v3 }
 0x20d   :  { %5345 = vmatprep.mubr.msk.bf16.mxu0 %vm6199_vm7, %v6198_v16 }
 0x214   :  { %5346 = vmatmul.mubr.msk.bf16.gmra.mrb[32].mxu0 %vm637_vm9, %v624_v19 }
 0x215   :  { %5353 = vmatprep.mubr.msk.bf16.mxu0 %vm6199_vm7, %v6198_v16 }
 0x21c   :  { %5354 = vmatmul.mubr.msk.bf16.vlgmr.msra.gmra.mrb[16].mxu0 %vm637_vm9, %v6409_v26  ;;  %v5903_v26 = vld [vmem:[%s7757_s2 + $0x38] sm:$0xff]  }
 0x21d   :  { %5374 = vmatpush3.bf16.msra.mxu0 %v5900_v35  ;;  %5357 = vmatprep.mubr.msk.bf16.mxu0 %vm6199_vm7, %v6198_v16 }
 0x21e   :  { %5375 = vmatprep.subr.bf16.mxu0 %v6198_v16 }
 0x221   :  { %5376 = vmatpush3.bf16.msra.mxu0 %v5901_v53 }
 0x222   :  { %5397 = vmatprep.subr.bf16.mxu0 %v6198_v16 }
 0x224   :  { %5358 = vmatmul.mubr.msk.bf16.gmra.mrb[20].mxu0 %vm637_vm9, %v6407_v24  ;;  %v5902_v24 = vld [vmem:[%s7757_s2 + $0x30] sm:$0xff]  }
 0x225   :  { %5361 = vmatprep.mubr.msk.bf16.mxu0 %vm6199_vm7, %v6198_v16 }
 0x22c   :  { %5362 = vmatmul.mubr.msk.bf16.gmra.mrb[24].mxu0 %vm637_vm9, %v6458_v60  ;;  %v5907_v60 = vld [vmem:[%s7757_s2 + $0x58] sm:$0xff]  }
 0x22d   :  { %5365 = vmatprep.mubr.msk.bf16.mxu0 %vm6199_vm7, %v6198_v16 }
 0x234   :  { %5366 = vmatmul.mubr.msk.bf16.gmra.mrb[28].mxu0 %vm637_vm9, %v6450_v55  ;;  %v5905_v55 = vld [vmem:[%s7757_s2 + $0x48] sm:$0xff]  }
 0x235   :  { %5369 = vmatprep.mubr.msk.bf16.mxu0 %vm6199_vm7, %v6198_v16 }
 0x23c   :  { %5370 = vmatmul.mubr.msk.bf16.gmra.mrb[32].mxu0 %vm637_vm9, %v6522_v40 }
 0x23d   :  { %5377 = vmatprep.mubr.msk.bf16.mxu0 %vm6199_vm7, %v6198_v16 }
 0x244   :  { %5378 = vmatmul.mubr.msk.bf16.vlgmr.msra.gmra.mrb[16].mxu0 %vm637_vm9, %v6433_v42  ;;  %v5904_v42 = vld [vmem:[%s7757_s2 + $0x40] sm:$0xff]  }
 0x245   :  { %5398 = vmatpush3.bf16.msra.mxu0 %v5902_v24  ;;  %5381 = vmatprep.mubr.msk.bf16.mxu0 %vm6199_vm7, %v6198_v16 }
 0x246   :  { %5399 = vmatprep.subr.bf16.mxu0 %v6198_v16 }
 0x249   :  { %5400 = vmatpush3.bf16.msra.mxu0 %v5903_v26 }
 0x24a   :  { %5421 = vmatprep.subr.bf16.mxu0 %v6198_v16 }
 0x24c   :  { %5382 = vmatmul.mubr.msk.bf16.gmra.mrb[20].mxu0 %vm637_vm9, %v6499_v17  ;;  %v5909_v17 = vld [vmem:[%s7757_s2 + $0x68] sm:$0xff]  }
 0x24d   :  { %5385 = vmatprep.mubr.msk.bf16.mxu0 %vm6199_vm7, %v6198_v16 }
 0x254   :  { %5386 = vmatmul.mubr.msk.bf16.gmra.mrb[24].mxu0 %vm637_vm9, %v6502_v18  ;;  %v5911_v18 = vld [vmem:[%s7757_s2 + $0x78] sm:$0xff]  }
 0x255   :  { %5389 = vmatprep.mubr.msk.bf16.mxu0 %vm6199_vm7, %v6198_v16 }
 0x25c   :  { %5390 = vmatmul.mubr.msk.bf16.gmra.mrb[28].mxu0 %vm637_vm9, %v6558_v11 }
 0x25d   :  { %5393 = vmatprep.mubr.msk.bf16.mxu0 %vm6199_vm7, %v6198_v16 }
 0x264   :  { %5394 = vmatmul.mubr.msk.bf16.gmra.mrb[32].mxu0 %vm637_vm9, %v832_v56 }
 0x265   :  { %5401 = vmatprep.mubr.msk.bf16.mxu0 %vm6199_vm7, %v6198_v16 }
 0x26c   :  { %5402 = vmatmul.mubr.msk.bf16.vlgmr.msra.gmra.mrb[16].mxu0 %vm637_vm9, %v6436_v43  ;;  %v5906_v43 = vld [vmem:[%s7757_s2 + $0x50] sm:$0xff]  }
 0x26d   :  { %5422 = vmatpush3.bf16.msra.mxu0 %v5904_v42  ;;  %5405 = vmatprep.mubr.msk.bf16.mxu0 %vm6199_vm7, %v6198_v16 }
 0x26e   :  { %5423 = vmatprep.subr.bf16.mxu0 %v6198_v16 }
 0x271   :  { %5424 = vmatpush3.bf16.msra.mxu0 %v5905_v55 }
 0x272   :  { %5445 = vmatprep.subr.bf16.mxu0 %v6198_v16 }
 0x274   :  { %5406 = vmatmul.mubr.msk.bf16.gmra.mrb[20].mxu0 %vm637_vm9, %v6505_v2  ;;  %v5913_v2 = vld [vmem:[%s7757_s2 + $0x88] sm:$0xff]  }
 0x275   :  { %5409 = vmatprep.mubr.msk.bf16.mxu0 %vm6199_vm7, %v6198_v16 }
 0x27c   :  { %5410 = vmatmul.mubr.msk.bf16.gmra.mrb[24].mxu0 %vm637_vm9, %v6510_v21 }
 0x27d   :  { %5413 = vmatprep.mubr.msk.bf16.mxu0 %vm6199_vm7, %v6198_v16 }
 0x284   :  { %5414 = vmatmul.mubr.msk.bf16.gmra.mrb[28].mxu0 %vm637_vm9, %v6563_v47 }
 0x285   :  { %5417 = vmatprep.mubr.msk.bf16.mxu0 %vm6199_vm7, %v6198_v16 }
 0x28c   :  { %5418 = vmatmul.mubr.msk.bf16.gmra.mrb[32].mxu0 %vm637_vm9, %v950_v57 }
 0x28d   :  { %5425 = vmatprep.mubr.msk.bf16.mxu0 %vm6199_vm7, %v6198_v16 }
 0x294   :  { %5426 = vmatmul.mubr.msk.bf16.vlgmr.msra.gmra.mrb[16].mxu0 %vm637_vm9, %v6493_v12  ;;  %v5908_v12 = vld [vmem:[%s7757_s2 + $0x60] sm:$0xff]  }
 0x295   :  { %5446 = vmatpush3.bf16.msra.mxu0 %v5906_v43  ;;  %5429 = vmatprep.mubr.msk.bf16.mxu0 %vm6199_vm7, %v6198_v16 }
 0x296   :  { %5447 = vmatprep.subr.bf16.mxu0 %v6198_v16 }
 0x299   :  { %5448 = vmatpush3.bf16.msra.mxu0 %v5907_v60 }
 0x29a   :  { %5469 = vmatprep.subr.bf16.mxu0 %v6198_v16 }
 0x29c   :  { %5430 = vmatmul.mubr.msk.bf16.gmra.mrb[20].mxu0 %vm637_vm9, %v6544_v61 }
 0x29d   :  { %5433 = vmatprep.mubr.msk.bf16.mxu0 %vm6199_vm7, %v6198_v16 }
 0x2a4   :  { %5434 = vmatmul.mubr.msk.bf16.gmra.mrb[24].mxu0 %vm637_vm9, %v6547_v48 }
 0x2a5   :  { %5437 = vmatprep.mubr.msk.bf16.mxu0 %vm6199_vm7, %v6198_v16 }
 0x2ac   :  { %5438 = vmatmul.mubr.msk.bf16.gmra.mrb[28].mxu0 %vm637_vm9, %v6596_v59  ;;  %v6865_v59 = vld [vmem:[%s7760_s5] ss:$0 sm:$0xff] }
 0x2ad   :  { %5441 = vmatprep.mubr.msk.bf16.mxu0 %vm6199_vm7, %v6198_v16 }
 0x2b4   :  { %5442 = vmatmul.mubr.msk.bf16.gmra.mrb[32].mxu0 %vm637_vm9, %v6578_v25 }
 0x2b5   :  { %5449 = vmatprep.mubr.msk.bf16.mxu0 %vm6199_vm7, %v6198_v16 }
 0x2bc   :  { %5450 = vmatmul.mubr.msk.bf16.vlgmr.msra.gmra.mrb[16].mxu0 %vm637_vm9, %v6455_v58  ;;  %v5910_v58 = vld [vmem:[%s7757_s2 + $0x70] sm:$0xff]  }
 0x2bd   :  { %5470 = vmatpush3.bf16.msra.mxu0 %v5908_v12  ;;  %5453 = vmatprep.mubr.msk.bf16.mxu0 %vm6199_vm7, %v6198_v16 }
 0x2be   :  { %5471 = vmatprep.subr.bf16.mxu0 %v6198_v16 }
 0x2c1   :  { %5472 = vmatpush3.bf16.msra.mxu0 %v5909_v17 }
 0x2c2   :  { %5493 = vmatprep.subr.bf16.mxu0 %v6198_v16 }
 0x2c4   :  { %5454 = vmatmul.mubr.msk.bf16.gmra.mrb[20].mxu0 %vm637_vm9, %v6531_v50 }
 0x2c5   :  { %5457 = vmatprep.mubr.msk.bf16.mxu0 %vm6199_vm7, %v6198_v16 }
 0x2cc   :  { %5458 = vmatmul.mubr.msk.bf16.gmra.mrb[24].mxu0 %vm637_vm9, %v6534_v51 }
 0x2cd   :  { %5461 = vmatprep.mubr.msk.bf16.mxu0 %vm6199_vm7, %v6198_v16 }
 0x2d4   :  { %5462 = vmatmul.mubr.msk.bf16.gmra.mrb[28].mxu0 %vm637_vm9, %v6568_v15 }
 0x2d5   :  { %5465 = vmatprep.mubr.msk.bf16.mxu0 %vm6199_vm7, %v6198_v16 }
 0x2dc   :  { %5466 = vmatmul.mubr.msk.bf16.gmra.mrb[32].mxu0 %vm637_vm9, %v1196_v8 }
 0x2dd   :  { %5473 = vmatprep.mubr.msk.bf16.mxu0 %vm6199_vm7, %v6198_v16 }
 0x2e4   :  { %5474 = vmatmul.mubr.msk.bf16.vlgmr.msra.gmra.mrb[16].mxu0 %vm637_vm9, %v6464_v62  ;;  %v5912_v62 = vld [vmem:[%s7757_s2 + $0x80] sm:$0xff]  }
 0x2e5   :  { %5494 = vmatpush3.bf16.msra.mxu0 %v5910_v58  ;;  %5477 = vmatprep.mubr.msk.bf16.mxu0 %vm6199_vm7, %v6198_v16 }
 0x2e6   :  { %5495 = vmatprep.subr.bf16.mxu0 %v6198_v16 }
 0x2e9   :  { %5496 = vmatpush3.bf16.msra.mxu0 %v5911_v18 }
 0x2ea   :  { %5517 = vmatprep.subr.bf16.mxu0 %v6198_v16 }
 0x2ec   :  { %5478 = vmatmul.mubr.msk.bf16.gmra.mrb[20].mxu0 %vm637_vm9, %v6553_v9 }
 0x2ed   :  { %5481 = vmatprep.mubr.msk.bf16.mxu0 %vm6199_vm7, %v6198_v16 }
 0x2f4   :  { %5482 = vmatmul.mubr.msk.bf16.gmra.mrb[24].mxu0 %vm637_vm9, %v6581_v29 }
 0x2f5   :  { %5485 = vmatprep.mubr.msk.bf16.mxu0 %vm6199_vm7, %v6198_v16 }
 0x2fc   :  { %5486 = vmatmul.mubr.msk.bf16.gmra.mrb[28].mxu0 %vm637_vm9, %v6584_v34 }
 0x2fd   :  { %5489 = vmatprep.mubr.msk.bf16.mxu0 %vm6199_vm7, %v6198_v16 }
 0x304   :  { %5490 = vmatmul.mubr.msk.bf16.gmra.mrb[32].mxu0 %vm637_vm9, %v6588_v36 }
 0x305   :  { %5497 = vmatprep.mubr.msk.bf16.mxu0 %vm6199_vm7, %v6198_v16 }
 0x30c   :  { %5498 = vmatmul.mubr.msk.bf16.vlgmr.msra.gmra.mrb[16].mxu0 %vm637_vm9, %v6603_v1 }
 0x30d   :  { %5518 = vmatpush3.bf16.msra.mxu0 %v5912_v62  ;;  %5501 = vmatprep.mubr.msk.bf16.mxu0 %vm6199_vm7, %v6198_v16 }
 0x30e   :  { %5519 = vmatprep.subr.bf16.mxu0 %v6198_v16 }
 0x311   :  { %5520 = vmatpush3.bf16.msra.mxu0 %v5913_v2 }
 0x314   :  { %5502 = vmatmul.mubr.msk.bf16.gmra.mrb[20].mxu0 %vm637_vm9, %v6608_v23 }
 0x315   :  { %5505 = vmatprep.mubr.msk.bf16.mxu0 %vm6199_vm7, %v6198_v16 }
 0x31c   :  { %5506 = vmatmul.mubr.msk.bf16.gmra.mrb[24].mxu0 %vm637_vm9, %v6613_v46 }
 0x31d   :  { %5509 = vmatprep.mubr.msk.bf16.mxu0 %vm6199_vm7, %v6198_v16 }
 0x324   :  { %5510 = vmatmul.mubr.msk.bf16.gmra.mrb[28].mxu0 %vm637_vm9, %v6623_v54 }
 0x325   :  { %5513 = vmatprep.mubr.msk.bf16.mxu0 %vm6199_vm7, %v6198_v16 }
 0x32c   :  { %5514 = vmatmul.mubr.msk.bf16.gmra.mrb[32].mxu0 %vm637_vm9, %v6626_v33 }
 0x32d   :  { %5521 = vmatprep.mubr.msk.bf16.mxu0 %vm6199_vm7, %v6198_v16 }
 0x334   :  { %5522 = vmatmul.mubr.msk.bf16.vlgmr.msra.gmra.mrb[16].mxu0 %vm637_vm9, %v6616_v52 }
 0x335   :  { %5525 = vmatprep.mubr.msk.bf16.mxu0 %vm6199_vm7, %v6198_v16 }
 0x33c   :  { %5526 = vmatmul.mubr.msk.bf16.gmra.mrb[20].mxu0 %vm637_vm9, %v6619_v13 }
 0x33d   :  { %5529 = vmatprep.mubr.msk.bf16.mxu0 %vm6199_vm7, %v6198_v16 }
 0x344   :  { %5530 = vmatmul.mubr.msk.bf16.gmra.mrb[24].mxu0 %vm637_vm9, %v6629_v20 }
 0x345   :  { %5533 = vmatprep.mubr.msk.bf16.mxu0 %vm6199_vm7, %v6198_v16 }
 0x34c   :  { %5534 = vmatmul.mubr.msk.bf16.gmra.mrb[28].mxu0 %vm637_vm9, %v6632_v22 }
 0x34d   :  { %5537 = vmatprep.mubr.msk.bf16.mxu0 %vm6199_vm7, %v6198_v16 }
 0x354   :  { %5538 = vmatmul.mubr.msk.bf16.gmra.mrb[32].mxu0 %vm637_vm9, %v6635_v4  ;;  %vm3525_vm9 = vsmask.f32 3328 }
 0x407   :  { %v1637_v21 = vpop.f32.mrb[16].mxu0 }
 0x408   :  { %v5523_v40 = vpop.f32.mrb[17].mxu0  ;;  %v1693_v51 = vrot.slane %v1637_v21, 1 }
 0x409   :  { %v1640_v50 = vpop.f32.mrb[18].mxu0 }
 0x40a   :  { %v1694_v56 = vrot.slane %v1640_v50, 1  ;;  %v5524_v57 = vpop.f32.mrb[19].mxu0 }
 0x40c   :  { %v1695_v61 = vsel %vm271_vm4, %v1693_v51, %v1694_v56 }
 0x40d   :  { %v1719_v48 = vmax.f32 %v1637_v21, %v1695_v61 }
 0x40f   :  { %v1645_v8 = vpop.f32.mrb[20].mxu0  ;;  %v1738_v34 = vrot.slane %v1719_v48, 6 }
 0x410   :  { %v1696_v9 = vrot.slane %v1645_v8, 1  ;;  %v5527_v10 = vpop.f32.mrb[21].mxu0 }
 0x411   :  { %v1648_v11 = vpop.f32.mrb[22].mxu0 }
 0x412   :  { %v1697_v47 = vsel %vm271_vm4, %v1694_v56, %v1696_v9  ;;  %v1698_v15 = vrot.slane %v1648_v11, 1  ;;  %v5528_v3 = vpop.f32.mrb[23].mxu0 }
 0x413   :  { %v1720_v25 = vmax.f32 %v1640_v50, %v1697_v47 }
 0x414   :  { %v1699_v29 = vsel %vm271_vm4, %v1696_v9, %v1698_v15 }
 0x415   :  { %v1739_v36 = vrot.slane %v1720_v25, 6  ;;  %v1721_v37 = vmax.f32 %v1645_v8, %v1699_v29 }
 0x417   :  { %v1741_v31 = vrot.slane %v1721_v37, 6  ;;  %v1653_v32 = vpop.f32.mrb[24].mxu0  ;;  %v1740_v63 = vsel %vm1307_vm11, %v1738_v34, %v1739_v36 }
 0x418   :  { %v1700_v38 = vrot.slane %v1653_v32, 1  ;;  %v5531_v39 = vpop.f32.mrb[25].mxu0  ;;  %v1764_v27 = vmax.f32 %v1719_v48, %v1740_v63 }
 0x419   :  { %v1656_v28 = vpop.f32.mrb[26].mxu0  ;;  %v1742_v7 = vsel %vm1307_vm11, %v1739_v36, %v1741_v31 }
 0x41a   :  { %v1701_v6 = vsel %vm271_vm4, %v1698_v15, %v1700_v38  ;;  %v1702_v1 = vrot.slane %v1656_v28, 1  ;;  %v5532_v41 = vpop.f32.mrb[27].mxu0  ;;  %v1765_v44 = vmax.f32 %v1720_v25, %v1742_v7  ;;  %v1779_v30 = vadd.f32 %v6865_v59, %v1764_v27 }
 0x41b   :  { %v1722_v23 = vmax.f32 %v1648_v11, %v1701_v6 }
 0x41c   :  { %v1703_v0 = vsel %vm271_vm4, %v1700_v38, %v1702_v1  ;;  %v1780_v45 = vadd.f32 %v6865_v59, %v1765_v44  ;;  %v1788_v52 = vmax.f32 %v1779_v30, 0.0 }
 0x41d   :  { %v1743_v49 = vrot.slane %v1722_v23, 6  ;;  %v1723_v46 = vmax.f32 %v1653_v32, %v1703_v0  ;;  %v6200_v0 = vmov 0  }
 0x41e   :  { %v1789_v13 = vmax.f32 %v1780_v45, 0.0  ;;  %v1835_v45 = vsel %vm1564_vm13, 65535, %v6200_v0 }
 0x41f   :  { %v1745_v14 = vrot.slane %v1723_v46, 6  ;;  %v1661_v54 = vpop.f32.mrb[28].mxu0  ;;  %v1744_v33 = vsel %vm1307_vm11, %v1741_v31, %v1743_v49 }
 0x420   :  { %v1704_v20 = vrot.slane %v1661_v54, 1  ;;  %v5535_v22 = vpop.f32.mrb[29].mxu0  ;;  %v1797_v4 = vpack.c.bf16 %v1789_v13, %v1788_v52  ;;  %v1766_v19 = vmax.f32 %v1721_v37, %v1744_v33  ;;  %v5917_v52 = vld [vmem:[%s7758_s3 + $0x80] ss:$16 sps:$4 sm:$0xff]   ;;  %v5915_v13 = vld [vmem:[%s7763_s8 + $0x8] sm:$0xff]  }
 0x421   :  { %v1664_v35 = vpop.f32.mrb[30].mxu0  ;;  %v1746_v53 = vsel %vm1307_vm11, %v1743_v49, %v1745_v14  ;;  %v5919_v49 = vld [vmem:[%s7758_s3 + $0x84] ss:$16 sps:$4 sm:$0xff]   ;;  %v5923_v22 = vld [vmem:[%s7758_s3 + $0xc0] ss:$16 sps:$4 sm:$0xff]  }
 0x422   :  { %v1705_v24 = vsel %vm271_vm4, %v1702_v1, %v1704_v20  ;;  %v1706_v26 = vrot.slane %v1664_v35, 1  ;;  %v5536_v42 = vpop.f32.mrb[31].mxu0  ;;  %5542 = vmatpush3.bf16.msra.mxu1 %v1797_v4  ;;  %v1767_v55 = vmax.f32 %v1722_v23, %v1746_v53  ;;  %v1781_v43 = vadd.f32 %v6865_v59, %v1766_v19  ;;  %v5922_v33 = vld [vmem:[%s7758_s3 + $0xa4] ss:$16 sps:$4 sm:$0xff]   ;;  %v5926_v4 = vld [vmem:[%s7758_s3 + $0xe0] ss:$16 sps:$4 sm:$0xff]  }
 0x423   :  { %v1724_v60 = vmax.f32 %v1656_v28, %v1705_v24  ;;  %5543 = vmatprep.subr.bf16.mxu1 %v6198_v16  ;;  %v5928_v19 = vld [vmem:[%s7758_s3 + $0xe4] ss:$16 sps:$4 sm:$0xff]  }
 0x424   :  { %v1707_v12 = vsel %vm271_vm4, %v1704_v20, %v1706_v26  ;;  %v1782_v17 = vadd.f32 %v6865_v59, %v1767_v55  ;;  %v1790_v62 = vmax.f32 %v1781_v43, 0.0  ;;  %v5925_v20 = vld [vmem:[%s7758_s3 + $0xc4] ss:$16 sps:$4 sm:$0xff]  }
 0x425   :  { %v1747_v58 = vrot.slane %v1724_v60, 6  ;;  %v1725_v18 = vmax.f32 %v1661_v54, %v1707_v12  ;;  %v5920_v54 = vld [vmem:[%s7758_s3 + $0xa0] ss:$16 sps:$4 sm:$0xff]  }
 0x426   :  { %v1791_v2 = vmax.f32 %v1782_v17, 0.0 }
 0x427   :  { %v1749_v21 = vrot.slane %v1725_v18, 6  ;;  %v1669_v40 = vpop.f32.mrb[32].mxu0  ;;  %v1748_v50 = vsel %vm1307_vm11, %v1745_v14, %v1747_v58  ;;  %v5916_v14 = vld [vmem:[%s7763_s8 + $0x10] sm:$0x1f]  }
 0x428   :  { %v1708_v51 = vrot.slane %v1669_v40, 1  ;;  %v5539_v56 = vpop.f32.mrb[33].mxu0  ;;  %v1798_v57 = vpack.c.bf16 %v1791_v2, %v1790_v62  ;;  %v1768_v61 = vmax.f32 %v1723_v46, %v1748_v50 }
 0x429   :  { %v1672_v48 = vpop.f32.mrb[34].mxu0  ;;  %v1750_v8 = vsel %vm1307_vm11, %v1747_v58, %v1749_v21 }
 0x42a   :  { %v1709_v9 = vsel %vm271_vm4, %v1706_v26, %v1708_v51  ;;  %v1727_v10 = vmax.f32 %v1669_v40, %v1708_v51  ;;  %v5540_v11 = vpop.f32.mrb[35].mxu0  ;;  %5544 = vmatpush3.bf16.msra.mxu1 %v1798_v57  ;;  %v1769_v47 = vmax.f32 %v1724_v60, %v1750_v8  ;;  %v1783_v15 = vadd.f32 %v6865_v59, %v1768_v61 }
 0x42b   :  { %v1726_v3 = vmax.f32 %v1664_v35, %v1709_v9  ;;  %5545 = vmatprep.subr.bf16.mxu1 %v6198_v16  ;;  %v5931_v35 = vld [vmem:[%s7758_s3 + $0x8c] ss:$16 sps:$4 sm:$0xff]  }
 0x42c   :  { %v1753_v25 = vrot.slane %v1727_v10, 6  ;;  %v1784_v29 = vadd.f32 %v6865_v59, %v1769_v47  ;;  %v1792_v37 = vmax.f32 %v1783_v15, 0.0 }
 0x42d   :  { %v1751_v34 = vrot.slane %v1726_v3, 6 }
 0x42e   :  { %v1772_v36 = vmax.f32 %v1727_v10, %v1753_v25  ;;  %v1793_v31 = vmax.f32 %v1784_v29, 0.0 }
 0x42f   :  { %v1754_v32 = vsel %vm1307_vm11, %v1751_v34, %v1753_v25  ;;  %v1752_v63 = vsel %vm1307_vm11, %v1749_v21, %v1751_v34 }
 0x430   :  { %v1771_v38 = vmax.f32 %v1726_v3, %v1754_v32  ;;  %v1787_v39 = vadd.f32 %v6865_v59, %v1772_v36  ;;  %v1799_v27 = vpack.c.bf16 %v1793_v31, %v1792_v37  ;;  %v1770_v28 = vmax.f32 %v1725_v18, %v1752_v63  ;;  %v5929_v31 = vld [vmem:[%s7758_s3 + $0x88] ss:$16 sps:$4 sm:$0xff]  }
 0x432   :  { %v1796_v7 = vmax.f32 %v1787_v39, 0.0  ;;  %5546 = vmatpush3.bf16.msra.mxu1 %v1799_v27  ;;  %v1785_v6 = vadd.f32 %v6865_v59, %v1770_v28  ;;  %v1786_v1 = vadd.f32 %v6865_v59, %v1771_v38  ;;  %v5914_v59 = vld [vmem:[%s7763_s8] sm:$0xff]   ;;  %v5934_v27 = vld [vmem:[%s7758_s3 + $0xac] ss:$16 sps:$4 sm:$0xff]  }
 0x433   :  { %5547 = vmatprep.subr.bf16.mxu1 %v6198_v16 }
 0x434   :  { %v1794_v41 = vmax.f32 %v1785_v6, 0.0  ;;  %v1795_v44 = vmax.f32 %v1786_v1, 0.0  ;;  %v1801_v30 = vpack.c.bf16 %v1796_v7, %v1796_v7 }
 0x436   :  { %v1800_v23 = vpack.c.bf16 %v1795_v44, %v1794_v41  ;;  %v1837_v46 = vand.u32 %v1835_v45, %v1801_v30 }
 0x438   :  { %5548 = vmatpush3.bf16.msra.mxu1 %v1800_v23 }
 0x439   :  { %5549 = vmatprep.subr.bf16.mxu1 %v6198_v16 }
 0x43c   :  { %5550 = vmatpush3.bf16.msra.mxu1 %v1837_v46 }
 0x43d   :  { %2151 = vmatprep.subr.bf16.mxu1 %v5919_v49 }
 0x43f   :  { %5552 = vmatmul.mubr.msk.bf16.vlgmr.msra.gmra.mrb[12].mxu1 %vm1823_vm14, %v5914_v59 }
 0x440   :  { %5555 = vmatprep.mubr.msk.bf16.mxu1 %vm6199_vm7, %v6198_v16  ;;  %2152 = vmatpush1.bf16.msra.mxu1 %v5917_v52  ;;  %v5932_v52 = vld [vmem:[%s7758_s3 + $0xa8] ss:$16 sps:$4 sm:$0xff]  }
 0x441   :  { %2153 = vmatprep.subr.bf16.mxu1 %v5922_v33 }
 0x444   :  { %2154 = vmatpush1.bf16.msra.mxu1 %v5920_v54  ;;  %v5937_v54 = vld [vmem:[%s7758_s3 + $0xcc] ss:$16 sps:$4 sm:$0xff]  }
 0x445   :  { %2155 = vmatprep.subr.bf16.mxu1 %v5925_v20 }
 0x447   :  { %5556 = vmatmul.mubr.msk.bf16.gmra.mrb[16].mxu1 %vm1823_vm14, %v5915_v13 }
 0x448   :  { %5559 = vmatprep.mubr.msk.bf16.mxu1 %vm6199_vm7, %v6198_v16  ;;  %2156 = vmatpush1.bf16.msra.mxu1 %v5923_v22 }
 0x449   :  { %2157 = vmatprep.subr.bf16.mxu1 %v5928_v19 }
 0x44c   :  { %2158 = vmatpush1.bf16.msra.mxu1 %v5926_v4 }
 0x44d   :  { %2204 = vmatprep.subr.bf16.mxu1 %v5931_v35 }
 0x44f   :  { %5560 = vmatmul.mubr.msk.bf16.gmra.mrb[20].mxu1 %vm1823_vm14, %v5916_v14 }
 0x450   :  { %2183 = vmatprep.mubr.bf16.mxu1 %v6200_v0 }
 0x512   :  { %v1873_v53 = vpop.f32.mrb[12].mxu1 }
 0x513   :  { %v5553_v24 = vpop.f32.mrb[13].mxu1 }
 0x514   :  { %v1876_v26 = vpop.f32.mrb[14].mxu1 }
 0x515   :  { %v6936_v42 = vpack.c.bf16 %v1876_v26, %v1873_v53  ;;  %v5554_v55 = vpop.f32.mrb[15].mxu1 }
 0x517   :  { %v2045_v43 = vshrl.u32 %v6936_v42, 16  ;;  %v2047_v60 = vshll.u32 %v6936_v42, 16  ;;  %v2450_v61 = vrot.slane %v6936_v42, 1  ;;  %v2664_v48 = vrot.slane %v6936_v42, 2 }
 0x518   :  { %v3099_v8 = vrot.slane %v6936_v42, 3  ;;  %v3312_v9 = vrot.slane %v6936_v42, 4  ;;  %v3746_v10 = vrot.slane %v6936_v42, 5 }
 0x519   :  { %v2878_v12 = vrot.slane %v2045_v43, 2  ;;  %v2879_v17 = vrot.slane %v2047_v60, 3  ;;  %v3526_v58 = vrot.slane %v2045_v43, 4  ;;  %v3527_v62 = vrot.slane %v2047_v60, 5 }
 0x51a   :  { %v1881_v18 = vpop.f32.mrb[16].mxu1  ;;  %v2049_v50 = vrot.slane %v2047_v60, 1 }
 0x51b   :  { %v5557_v2 = vpop.f32.mrb[17].mxu1  ;;  %v2880_v21 = vor.u32 %v2879_v17, %v2878_v12  ;;  %v3528_v51 = vor.u32 %v3527_v62, %v3526_v58  ;;  %v5940_v58 = vld [vmem:[%s7758_s3 + $0xec] ss:$16 sps:$4 sm:$0xff]  }
 0x51c   :  { %v1884_v40 = vpop.f32.mrb[18].mxu1  ;;  %v2050_v25 = vor.u32 %v2049_v50, %v2045_v43  ;;  %v5935_v43 = vld [vmem:[%s7758_s3 + $0xc8] ss:$16 sps:$4 sm:$0xff]  }
 0x51d   :  { %v6940_v56 = vpack.c.bf16 %v1884_v40, %v1881_v18  ;;  %v5558_v57 = vpop.f32.mrb[19].mxu1 }
 0x51f   :  { %v2052_v11 = vshll.u32 %v6940_v56, 16  ;;  %v2056_v47 = vshrl.u32 %v6940_v56, 16  ;;  %v2451_v15 = vrot.slane %v6940_v56, 1  ;;  %v2665_v3 = vrot.slane %v6940_v56, 2 }
 0x520   :  { %v3100_v29 = vrot.slane %v6940_v56, 3  ;;  %v3313_v34 = vrot.slane %v6940_v56, 4  ;;  %v3747_v36 = vrot.slane %v6940_v56, 5 }
 0x521   :  { %v2054_v37 = vrot.slane %v2052_v11, 1  ;;  %v6958_v32 = vsel %vm271_vm4, %v2450_v61, %v2451_v15  ;;  %v6961_v63 = vsel %vm153_vm1, %v2664_v48, %v2665_v3  ;;  %v2881_v38 = vrot.slane %v2056_v47, 2  ;;  %v5938_v61 = vld [vmem:[%s7758_s3 + $0xe8] ss:$16 sps:$4 sm:$0xff]  }
 0x522   :  { %v1889_v39 = vpop.f32.mrb[20].mxu1  ;;  %v2882_v28 = vrot.slane %v2052_v11, 3  ;;  %v6967_v7 = vsel %vm152_vm0, %v3099_v8, %v3100_v29  ;;  %v6970_v6 = vsel %vm456_vm6, %v3312_v9, %v3313_v34  ;;  %v3529_v1 = vrot.slane %v2056_v47, 4  ;;  %v5943_v8 = vld [vmem:[%s7758_s3 + $0x4] ss:$16 sps:$4 sm:$0xff]  }
 0x523   :  { %v5561_v41 = vpop.f32.mrb[21].mxu1  ;;  %v2055_v44 = vsel %vm585_vm8, %v2050_v25, %v2054_v37  ;;  %v3530_v30 = vrot.slane %v2052_v11, 5  ;;  %v6974_v23 = vsel %vm455_vm5, %v3746_v10, %v3747_v36  ;;  %v2058_v14 = vor.u32 %v2056_v47, %v2054_v37  ;;  %v5941_v11 = vld [vmem:[%s7758_s3] ss:$16 sps:$4 sm:$0xff]   ;;  %v5946_v47 = vld [vmem:[%s7758_s3 + $0x24] ss:$16 sps:$4 sm:$0xff]  }
 0x524   :  { %v1892_v45 = vpop.f32.mrb[22].mxu1  ;;  %4917 = vmatmul.mubr.msk.bf16.vlgmr.msra.gmra.mrb[24].mxu1 %vm2144_vm15, %v2055_v44  ;;  %v2883_v49 = vor.u32 %v2882_v28, %v2881_v38  ;;  %v5947_v25 = vld [vmem:[%s7758_s3 + $0x40] ss:$16 sps:$4 sm:$0xff]   ;;  %v5953_v37 = vld [vmem:[%s7758_s3 + $0x8] ss:$16 sps:$4 sm:$0xff]  }
 0x525   :  { %v1898_v46 = vpack.c.bf16 %v1892_v45, %v1889_v39  ;;  %v5562_v59 = vpop.f32.mrb[23].mxu1  ;;  %2205 = vmatpush1.bf16.msra.mxu1 %v5929_v31  ;;  %2193 = vmatprep.mubr.bf16.mxu1 %v6200_v0  ;;  %v3531_v13 = vor.u32 %v3530_v30, %v3529_v1  ;;  %v5958_v31 = vld [vmem:[%s7758_s3 + $0x2c] ss:$16 sps:$4 sm:$0xff]   ;;  %v5956_v38 = vld [vmem:[%s7758_s3 + $0x28] ss:$16 sps:$4 sm:$0xff]  }
 0x526   :  { %2206 = vmatprep.subr.bf16.mxu1 %v5934_v27  ;;  %v6985_v33 = vsel %vm2877_vm3, %v2880_v21, %v2883_v49  ;;  %v5961_v39 = vld [vmem:[%s7758_s3 + $0x4c] ss:$16 sps:$4 sm:$0xff]   ;;  %v5959_v27 = vld [vmem:[%s7758_s3 + $0x48] ss:$16 sps:$4 sm:$0xff]   ;;  %v5967_v41 = vld [vmem:[%s7758_s3 + $0x104] ss:$16 sps:$4 sm:$0xff]  }
 0x527   :  { %v2060_v20 = vshll.u32 %v1898_v46, 16  ;;  %v2453_v22 = vrot.slane %v1898_v46, 1  ;;  %v2667_v4 = vrot.slane %v1898_v46, 2  ;;  %v2885_v19 = vshrl.u32 %v1898_v46, 16  ;;  %v5964_v28 = vld [vmem:[%s7758_s3 + $0x6c] ss:$16 sps:$4 sm:$0xff]  }
 0x528   :  { %v3102_v35 = vrot.slane %v1898_v46, 3  ;;  %v3315_v53 = vrot.slane %v1898_v46, 4  ;;  %v6988_v24 = vsel %vm3525_vm9, %v3528_v51, %v3531_v13  ;;  %v3749_v26 = vrot.slane %v1898_v46, 5  ;;  %v5962_v1 = vld [vmem:[%s7758_s3 + $0x68] ss:$16 sps:$4 sm:$0xff]  }
 0x529   :  { %2207 = vmatpush1.bf16.msra.mxu1 %v5932_v52  ;;  %v2062_v55 = vrot.slane %v2060_v20, 1  ;;  %v6994_v60 = vsel %vm271_vm4, %v2451_v15, %v2453_v22  ;;  %v6997_v12 = vsel %vm153_vm1, %v2665_v3, %v2667_v4  ;;  %v2887_v17 = vrot.slane %v2885_v19, 2  ;;  %v5944_v15 = vld [vmem:[%s7758_s3 + $0x20] ss:$16 sps:$4 sm:$0xff]   ;;  %v5949_v3 = vld [vmem:[%s7758_s3 + $0x44] ss:$16 sps:$4 sm:$0xff]  }
 0x52a   :  { %2208 = vmatprep.subr.bf16.mxu1 %v5937_v54  ;;  %v2888_v18 = vrot.slane %v2060_v20, 3  ;;  %v7003_v62 = vsel %vm152_vm0, %v3100_v29, %v3102_v35  ;;  %v7006_v2 = vsel %vm456_vm6, %v3313_v34, %v3315_v53  ;;  %v3533_v21 = vrot.slane %v2885_v19, 4  ;;  %v5952_v29 = vld [vmem:[%s7758_s3 + $0x64] ss:$16 sps:$4 sm:$0xff]   ;;  %v5950_v34 = vld [vmem:[%s7758_s3 + $0x60] ss:$16 sps:$4 sm:$0xff]  }
 0x52b   :  { %v2063_v40 = vsel %vm585_vm8, %v2058_v14, %v2062_v55  ;;  %v3534_v50 = vrot.slane %v2060_v20, 5  ;;  %v7010_v51 = vsel %vm455_vm5, %v3747_v36, %v3749_v26  ;;  %v5955_v36 = vld [vmem:[%s7758_s3 + $0xc] ss:$16 sps:$4 sm:$0xff]   ;;  %v5970_v30 = vld [vmem:[%s7758_s3 + $0x124] ss:$16 sps:$4 sm:$0xff]  }
 0x52c   :  { %4918 = vmatmul.mubr.msk.bf16.gmra.mrb[28].mxu1 %vm2144_vm15, %v2063_v40  ;;  %v2889_v57 = vor.u32 %v2888_v18, %v2887_v17  ;;  %v5968_v45 = vld [vmem:[%s7758_s3 + $0x120] ss:$16 sps:$4 sm:$0xff]   ;;  %v5979_v52 = vld [vmem:[%s7758_s3 + $0x10c] ss:$16 sps:$4 sm:$0xff]   ;;  %v5980_v14 = vld [vmem:[%s7758_s3 + $0x128] ss:$16 sps:$4 sm:$0xff]  }
 0x52d   :  { %2209 = vmatpush1.bf16.msra.mxu1 %v5935_v43  ;;  %2236 = vmatprep.mubr.bf16.mxu1 %v6200_v0  ;;  %v3535_v48 = vor.u32 %v3534_v50, %v3533_v21  ;;  %v5971_v46 = vld [vmem:[%s7758_s3 + $0x140] ss:$16 sps:$4 sm:$0xff]   ;;  %v5985_v54 = vld [vmem:[%s7758_s3 + $0x14c] ss:$16 sps:$4 sm:$0xff]   ;;  %v5983_v20 = vld [vmem:[%s7758_s3 + $0x148] ss:$16 sps:$4 sm:$0xff]  }
 0x52e   :  { %2210 = vmatprep.subr.bf16.mxu1 %v5940_v58  ;;  %v7021_v9 = vsel %vm2877_vm3, %v2883_v49, %v2889_v57  ;;  %v5973_v49 = vld [vmem:[%s7758_s3 + $0x144] ss:$16 sps:$4 sm:$0xff]   ;;  %v5974_v59 = vld [vmem:[%s7758_s3 + $0x160] ss:$16 sps:$4 sm:$0xff]   ;;  %v5988_v22 = vld [vmem:[%s7758_s3 + $0x16c] ss:$16 sps:$4 sm:$0xff]  }
 0x52f   :  { %v7024_v10 = vsel %vm3525_vm9, %v3531_v13, %v3535_v48  ;;  %v5977_v13 = vld [vmem:[%s7758_s3 + $0x108] ss:$16 sps:$4 sm:$0xff]   ;;  %v5991_v19 = vld [vmem:[%s7758_s3 + $0x184] ss:$16 sps:$4 sm:$0xff]   ;;  %v5989_v35 = vld [vmem:[%s7758_s3 + $0x180] ss:$16 sps:$4 sm:$0xff]  }
 0x530   :  { %v5986_v4 = vld [vmem:[%s7758_s3 + $0x168] ss:$16 sps:$4 sm:$0xff]   ;;  %v5994_v53 = vld [vmem:[%s7758_s3 + $0x1a4] ss:$16 sps:$4 sm:$0xff]   ;;  %v5992_v26 = vld [vmem:[%s7758_s3 + $0x1a0] ss:$16 sps:$4 sm:$0xff]  }
 0x531   :  { %2211 = vmatpush1.bf16.msra.mxu1 %v5938_v61  ;;  %v5997_v55 = vld [vmem:[%s7758_s3 + $0x1c4] ss:$16 sps:$4 sm:$0xff]   ;;  %v5995_v43 = vld [vmem:[%s7758_s3 + $0x1c0] ss:$16 sps:$4 sm:$0xff]   ;;  %v6003_v58 = vld [vmem:[%s7758_s3 + $0x18c] ss:$16 sps:$4 sm:$0xff]  }
 0x532   :  { %2341 = vmatprep.subr.bf16.mxu1 %v5943_v8  ;;  %v5998_v17 = vld [vmem:[%s7758_s3 + $0x1e0] ss:$16 sps:$4 sm:$0xff]   ;;  %v6001_v18 = vld [vmem:[%s7758_s3 + $0x188] ss:$16 sps:$4 sm:$0xff]   ;;  %v6012_v57 = vld [vmem:[%s7758_s3 + $0x1ec] ss:$16 sps:$4 sm:$0xff]  }
 0x533   :  { %v6004_v21 = vld [vmem:[%s7758_s3 + $0x1a8] ss:$16 sps:$4 sm:$0xff]   ;;  %v6015_v48 = vld [vmem:[%s7758_s3 + $0x204] ss:$16 sps:$4 sm:$0xff]   ;;  %v6013_v8 = vld [vmem:[%s7758_s3 + $0x200] ss:$16 sps:$4 sm:$0xff]  }
 0x534   :  { %4919 = vmatmul.mubr.msk.bf16.vlgmr.msra.gmra.mrb[32].mxu1 %vm2144_vm15, %v2055_v44  ;;  %v5965_v44 = vld [vmem:[%s7758_s3 + $0x100] ss:$16 sps:$4 sm:$0xff]   ;;  %v6007_v50 = vld [vmem:[%s7758_s3 + $0x1c8] ss:$16 sps:$4 sm:$0xff]  }
 0x535   :  { %2342 = vmatpush1.bf16.msra.mxu1 %v5941_v11  ;;  %2246 = vmatprep.mubr.bf16.mxu1 %v6200_v0  ;;  %v6010_v61 = vld [vmem:[%s7758_s3 + $0x1e8] ss:$16 sps:$4 sm:$0xff]   ;;  %v6018_v11 = vld [vmem:[%s7758_s3 + $0x224] ss:$16 sps:$4 sm:$0xff]  }
 0x536   :  { %2343 = vmatprep.subr.bf16.mxu1 %v5946_v47  ;;  %v6016_v47 = vld [vmem:[%s7758_s3 + $0x220] ss:$16 sps:$4 sm:$0xff]  }
 0x539   :  { %2344 = vmatpush1.bf16.msra.mxu1 %v5944_v15  ;;  %v6021_v15 = vld [vmem:[%s7758_s3 + $0x244] ss:$16 sps:$4 sm:$0xff]  }
 0x53a   :  { %2345 = vmatprep.subr.bf16.mxu1 %v5949_v3  ;;  %v6019_v3 = vld [vmem:[%s7758_s3 + $0x240] ss:$16 sps:$4 sm:$0xff]  }
 0x53c   :  { %4920 = vmatmul.mubr.msk.bf16.gmra.mrb[36].mxu1 %vm2144_vm15, %v2063_v40  ;;  %v6009_v40 = vld [vmem:[%s7758_s3 + $0x1cc] ss:$16 sps:$4 sm:$0xff]  }
 0x53d   :  { %2346 = vmatpush1.bf16.msra.mxu1 %v5947_v25  ;;  %2373 = vmatprep.mubr.bf16.mxu1 %v6200_v0  ;;  %v6022_v25 = vld [vmem:[%s7758_s3 + $0x260] ss:$16 sps:$4 sm:$0xff]  }
 0x53e   :  { %2347 = vmatprep.subr.bf16.mxu1 %v5952_v29  ;;  %v6027_v29 = vld [vmem:[%s7758_s3 + $0x20c] ss:$16 sps:$4 sm:$0xff]  }
 0x541   :  { %2348 = vmatpush1.bf16.msra.mxu1 %v5950_v34  ;;  %v6025_v34 = vld [vmem:[%s7758_s3 + $0x208] ss:$16 sps:$4 sm:$0xff]  }
 0x542   :  { %2394 = vmatprep.subr.bf16.mxu1 %v5955_v36  ;;  %v6028_v36 = vld [vmem:[%s7758_s3 + $0x228] ss:$16 sps:$4 sm:$0xff]  }
 0x544   :  { %4937 = vmatmul.mubr.msk.bf16.vlgmr.msra.gmra.mrb[24].mxu1 %vm2144_vm15, %v6936_v42 }
 0x545   :  { %2395 = vmatpush1.bf16.msra.mxu1 %v5953_v37  ;;  %2383 = vmatprep.mubr.bf16.mxu1 %v6200_v0  ;;  %v6033_v37 = vld [vmem:[%s7758_s3 + $0x24c] ss:$16 sps:$4 sm:$0xff]  }
 0x546   :  { %2396 = vmatprep.subr.bf16.mxu1 %v5958_v31  ;;  %v6031_v31 = vld [vmem:[%s7758_s3 + $0x248] ss:$16 sps:$4 sm:$0xff]  }
 0x549   :  { %2397 = vmatpush1.bf16.msra.mxu1 %v5956_v38  ;;  %v6036_v38 = vld [vmem:[%s7758_s3 + $0x26c] ss:$16 sps:$4 sm:$0xff]  }
 0x54a   :  { %2398 = vmatprep.subr.bf16.mxu1 %v5961_v39  ;;  %v6034_v39 = vld [vmem:[%s7758_s3 + $0x268] ss:$16 sps:$4 sm:$0xff]  }
 0x54c   :  { %4938 = vmatmul.mubr.msk.bf16.gmra.mrb[28].mxu1 %vm2144_vm15, %v6940_v56 }
 0x54d   :  { %2399 = vmatpush1.bf16.msra.mxu1 %v5959_v27  ;;  %2426 = vmatprep.mubr.bf16.mxu1 %v6200_v0  ;;  %v6039_v27 = vld [vmem:[%s7758_s3 + $0x284] ss:$16 sps:$4 sm:$0xff]  }
 0x54e   :  { %2400 = vmatprep.subr.bf16.mxu1 %v5964_v28  ;;  %v6037_v28 = vld [vmem:[%s7758_s3 + $0x280] ss:$16 sps:$4 sm:$0xff]  }
 0x551   :  { %2401 = vmatpush1.bf16.msra.mxu1 %v5962_v1  ;;  %v6042_v1 = vld [vmem:[%s7758_s3 + $0x2a4] ss:$16 sps:$4 sm:$0xff]  }
 0x552   :  { %2541 = vmatprep.subr.bf16.mxu1 %v5967_v41  ;;  %v6040_v41 = vld [vmem:[%s7758_s3 + $0x2a0] ss:$16 sps:$4 sm:$0xff]  }
 0x554   :  { %4939 = vmatmul.mubr.msk.bf16.vlgmr.msra.gmra.mrb[32].mxu1 %vm2144_vm15, %v6936_v42  ;;  %v5976_v42 = vld [vmem:[%s7758_s3 + $0x164] ss:$16 sps:$4 sm:$0xff]  }
 0x555   :  { %2542 = vmatpush1.bf16.msra.mxu1 %v5965_v44  ;;  %2436 = vmatprep.mubr.bf16.mxu1 %v6200_v0  ;;  %v6045_v44 = vld [vmem:[%s7758_s3 + $0x2c4] ss:$16 sps:$4 sm:$0xff]  }
 0x556   :  { %2543 = vmatprep.subr.bf16.mxu1 %v5970_v30  ;;  %v6043_v30 = vld [vmem:[%s7758_s3 + $0x2c0] ss:$16 sps:$4 sm:$0xff]  }
 0x559   :  { %2544 = vmatpush1.bf16.msra.mxu1 %v5968_v45  ;;  %v6046_v45 = vld [vmem:[%s7758_s3 + $0x2e0] ss:$16 sps:$4 sm:$0xff]  }
 0x55a   :  { %2545 = vmatprep.subr.bf16.mxu1 %v5973_v49  ;;  %v6051_v49 = vld [vmem:[%s7758_s3 + $0x28c] ss:$16 sps:$4 sm:$0xff]  }
 0x55c   :  { %4940 = vmatmul.mubr.msk.bf16.gmra.mrb[36].mxu1 %vm2144_vm15, %v6940_v56  ;;  %v5982_v56 = vld [vmem:[%s7758_s3 + $0x12c] ss:$16 sps:$4 sm:$0xff]  }
 0x55d   :  { %2546 = vmatpush1.bf16.msra.mxu1 %v5971_v46  ;;  %2573 = vmatprep.mubr.bf16.mxu1 %v6200_v0  ;;  %v6049_v46 = vld [vmem:[%s7758_s3 + $0x288] ss:$16 sps:$4 sm:$0xff]  }
 0x55e   :  { %2547 = vmatprep.subr.bf16.mxu1 %v5976_v42  ;;  %v6052_v42 = vld [vmem:[%s7758_s3 + $0x2a8] ss:$16 sps:$4 sm:$0xff]  }
 0x561   :  { %2548 = vmatpush1.bf16.msra.mxu1 %v5974_v59  ;;  %v6057_v59 = vld [vmem:[%s7758_s3 + $0x2cc] ss:$16 sps:$4 sm:$0xff]  }
 0x562   :  { %2594 = vmatprep.subr.bf16.mxu1 %v5979_v52  ;;  %v6055_v52 = vld [vmem:[%s7758_s3 + $0x2c8] ss:$16 sps:$4 sm:$0xff]  }
 0x564   :  { %4957 = vmatmul.mubr.msk.bf16.vlgmr.msra.gmra.mrb[24].mxu1 %vm2144_vm15, %v6958_v32 }
 0x565   :  { %2595 = vmatpush1.bf16.msra.mxu1 %v5977_v13  ;;  %2583 = vmatprep.mubr.bf16.mxu1 %v6200_v0  ;;  %v6060_v13 = vld [vmem:[%s7758_s3 + $0x2ec] ss:$16 sps:$4 sm:$0xff]  }
 0x566   :  { %2596 = vmatprep.subr.bf16.mxu1 %v5982_v56  ;;  %v6058_v56 = vld [vmem:[%s7758_s3 + $0x2e8] ss:$16 sps:$4 sm:$0xff]  }
 0x569   :  { %2597 = vmatpush1.bf16.msra.mxu1 %v5980_v14  ;;  %v6063_v14 = vld [vmem:[%s7758_s3 + $0x304] ss:$16 sps:$4 sm:$0xff]  }
 0x56a   :  { %2598 = vmatprep.subr.bf16.mxu1 %v5985_v54  ;;  %v6061_v54 = vld [vmem:[%s7758_s3 + $0x300] ss:$16 sps:$4 sm:$0xff]  }
 0x56c   :  { %4958 = vmatmul.mubr.msk.bf16.gmra.mrb[28].mxu1 %vm2144_vm15, %v6994_v60 }
 0x56d   :  { %2599 = vmatpush1.bf16.msra.mxu1 %v5983_v20  ;;  %2626 = vmatprep.mubr.bf16.mxu1 %v6200_v0  ;;  %v6066_v20 = vld [vmem:[%s7758_s3 + $0x324] ss:$16 sps:$4 sm:$0xff]  }
 0x56e   :  { %2600 = vmatprep.subr.bf16.mxu1 %v5988_v22  ;;  %v6064_v22 = vld [vmem:[%s7758_s3 + $0x320] ss:$16 sps:$4 sm:$0xff]  }
 0x571   :  { %2601 = vmatpush1.bf16.msra.mxu1 %v5986_v4  ;;  %v6069_v4 = vld [vmem:[%s7758_s3 + $0x344] ss:$16 sps:$4 sm:$0xff]  }
 0x572   :  { %2755 = vmatprep.subr.bf16.mxu1 %v5991_v19  ;;  %v6067_v19 = vld [vmem:[%s7758_s3 + $0x340] ss:$16 sps:$4 sm:$0xff]  }
 0x574   :  { %4959 = vmatmul.mubr.msk.bf16.vlgmr.msra.gmra.mrb[32].mxu1 %vm2144_vm15, %v6958_v32  ;;  %v6000_v32 = vld [vmem:[%s7758_s3 + $0x1e4] ss:$16 sps:$4 sm:$0xff]  }
 0x575   :  { %2756 = vmatpush1.bf16.msra.mxu1 %v5989_v35  ;;  %2636 = vmatprep.mubr.bf16.mxu1 %v6200_v0  ;;  %v6070_v35 = vld [vmem:[%s7758_s3 + $0x360] ss:$16 sps:$4 sm:$0xff]  }
 0x576   :  { %2757 = vmatprep.subr.bf16.mxu1 %v5994_v53  ;;  %v6075_v53 = vld [vmem:[%s7758_s3 + $0x30c] ss:$16 sps:$4 sm:$0xff]  }
 0x579   :  { %2758 = vmatpush1.bf16.msra.mxu1 %v5992_v26  ;;  %v6073_v26 = vld [vmem:[%s7758_s3 + $0x308] ss:$16 sps:$4 sm:$0xff]  }
 0x57a   :  { %2759 = vmatprep.subr.bf16.mxu1 %v5997_v55  ;;  %v6076_v55 = vld [vmem:[%s7758_s3 + $0x328] ss:$16 sps:$4 sm:$0xff]  }
 0x57c   :  { %4960 = vmatmul.mubr.msk.bf16.gmra.mrb[36].mxu1 %vm2144_vm15, %v6994_v60  ;;  %v6006_v60 = vld [vmem:[%s7758_s3 + $0x1ac] ss:$16 sps:$4 sm:$0xff]  }
 0x57d   :  { %2760 = vmatpush1.bf16.msra.mxu1 %v5995_v43  ;;  %2787 = vmatprep.mubr.bf16.mxu1 %v6200_v0  ;;  %v6081_v43 = vld [vmem:[%s7758_s3 + $0x34c] ss:$16 sps:$4 sm:$0xff]  }
 0x57e   :  { %2761 = vmatprep.subr.bf16.mxu1 %v6000_v32  ;;  %v6079_v32 = vld [vmem:[%s7758_s3 + $0x348] ss:$16 sps:$4 sm:$0xff]  }
 0x581   :  { %2762 = vmatpush1.bf16.msra.mxu1 %v5998_v17  ;;  %v6084_v17 = vld [vmem:[%s7758_s3 + $0x36c] ss:$16 sps:$4 sm:$0xff]  }
 0x582   :  { %2808 = vmatprep.subr.bf16.mxu1 %v6003_v58  ;;  %v6082_v58 = vld [vmem:[%s7758_s3 + $0x368] ss:$16 sps:$4 sm:$0xff]  }
 0x584   :  { %4977 = vmatmul.mubr.msk.bf16.vlgmr.msra.gmra.mrb[24].mxu1 %vm2144_vm15, %v6961_v63 }
 0x585   :  { %2809 = vmatpush1.bf16.msra.mxu1 %v6001_v18  ;;  %2797 = vmatprep.mubr.bf16.mxu1 %v6200_v0  ;;  %v6087_v18 = vld [vmem:[%s7758_s3 + $0x384] ss:$16 sps:$4 sm:$0xff]  }
 0x586   :  { %2810 = vmatprep.subr.bf16.mxu1 %v6006_v60  ;;  %v6085_v60 = vld [vmem:[%s7758_s3 + $0x380] ss:$16 sps:$4 sm:$0xff]  }
 0x589   :  { %2811 = vmatpush1.bf16.msra.mxu1 %v6004_v21  ;;  %v6090_v21 = vld [vmem:[%s7758_s3 + $0x3a4] ss:$16 sps:$4 sm:$0xff]  }
 0x58a   :  { %2812 = vmatprep.subr.bf16.mxu1 %v6009_v40  ;;  %v6088_v40 = vld [vmem:[%s7758_s3 + $0x3a0] ss:$16 sps:$4 sm:$0xff]  }
 0x58c   :  { %4978 = vmatmul.mubr.msk.bf16.gmra.mrb[28].mxu1 %vm2144_vm15, %v6997_v12 }
 0x58d   :  { %2813 = vmatpush1.bf16.msra.mxu1 %v6007_v50  ;;  %2840 = vmatprep.mubr.bf16.mxu1 %v6200_v0  ;;  %v6093_v50 = vld [vmem:[%s7758_s3 + $0x3c4] ss:$16 sps:$4 sm:$0xff]  }
 0x58e   :  { %2814 = vmatprep.subr.bf16.mxu1 %v6012_v57  ;;  %v6091_v57 = vld [vmem:[%s7758_s3 + $0x3c0] ss:$16 sps:$4 sm:$0xff]  }
 0x591   :  { %2815 = vmatpush1.bf16.msra.mxu1 %v6010_v61  ;;  %v6094_v61 = vld [vmem:[%s7758_s3 + $0x3e0] ss:$16 sps:$4 sm:$0xff]  }
 0x592   :  { %2977 = vmatprep.subr.bf16.mxu1 %v6015_v48  ;;  %v6099_v48 = vld [vmem:[%s7758_s3 + $0x38c] ss:$16 sps:$4 sm:$0xff]  }
 0x594   :  { %4979 = vmatmul.mubr.msk.bf16.vlgmr.msra.gmra.mrb[32].mxu1 %vm2144_vm15, %v6961_v63  ;;  %v6024_v63 = vld [vmem:[%s7758_s3 + $0x264] ss:$16 sps:$4 sm:$0xff]  }
 0x595   :  { %2978 = vmatpush1.bf16.msra.mxu1 %v6013_v8  ;;  %2850 = vmatprep.mubr.bf16.mxu1 %v6200_v0  ;;  %v6097_v8 = vld [vmem:[%s7758_s3 + $0x388] ss:$16 sps:$4 sm:$0xff]  }
 0x596   :  { %2979 = vmatprep.subr.bf16.mxu1 %v6018_v11  ;;  %v6100_v11 = vld [vmem:[%s7758_s3 + $0x3a8] ss:$16 sps:$4 sm:$0xff]  }
 0x599   :  { %2980 = vmatpush1.bf16.msra.mxu1 %v6016_v47  ;;  %v6105_v47 = vld [vmem:[%s7758_s3 + $0x3cc] ss:$16 sps:$4 sm:$0xff]  }
 0x59a   :  { %2981 = vmatprep.subr.bf16.mxu1 %v6021_v15  ;;  %v6103_v15 = vld [vmem:[%s7758_s3 + $0x3c8] ss:$16 sps:$4 sm:$0xff]  }
 0x59c   :  { %4980 = vmatmul.mubr.msk.bf16.gmra.mrb[36].mxu1 %vm2144_vm15, %v6997_v12  ;;  %v6030_v12 = vld [vmem:[%s7758_s3 + $0x22c] ss:$16 sps:$4 sm:$0xff]  }
 0x59d   :  { %2982 = vmatpush1.bf16.msra.mxu1 %v6019_v3  ;;  %3009 = vmatprep.mubr.bf16.mxu1 %v6200_v0  ;;  %v6108_v3 = vld [vmem:[%s7758_s3 + $0x3ec] ss:$16 sps:$4 sm:$0xff]  }
 0x59e   :  { %2983 = vmatprep.subr.bf16.mxu1 %v6024_v63  ;;  %v6106_v63 = vld [vmem:[%s7758_s3 + $0x3e8] ss:$16 sps:$4 sm:$0xff]  }
 0x5a1   :  { %2984 = vmatpush1.bf16.msra.mxu1 %v6022_v25  ;;  %v6111_v25 = vld [vmem:[%s7758_s3 + $0x404] ss:$16 sps:$4 sm:$0xff]  }
 0x5a2   :  { %3030 = vmatprep.subr.bf16.mxu1 %v6027_v29  ;;  %v6109_v29 = vld [vmem:[%s7758_s3 + $0x400] ss:$16 sps:$4 sm:$0xff]  }
 0x5a4   :  { %4997 = vmatmul.mubr.msk.bf16.vlgmr.msra.gmra.mrb[24].mxu1 %vm2144_vm15, %v6985_v33 }
 0x5a5   :  { %3031 = vmatpush1.bf16.msra.mxu1 %v6025_v34  ;;  %3019 = vmatprep.mubr.bf16.mxu1 %v6200_v0  ;;  %v6114_v34 = vld [vmem:[%s7758_s3 + $0x424] ss:$16 sps:$4 sm:$0xff]  }
 0x5a6   :  { %3032 = vmatprep.subr.bf16.mxu1 %v6030_v12  ;;  %v6112_v12 = vld [vmem:[%s7758_s3 + $0x420] ss:$16 sps:$4 sm:$0xff]  }
 0x5a9   :  { %3033 = vmatpush1.bf16.msra.mxu1 %v6028_v36  ;;  %v6117_v36 = vld [vmem:[%s7758_s3 + $0x444] ss:$16 sps:$4 sm:$0xff]  }
 0x5aa   :  { %3034 = vmatprep.subr.bf16.mxu1 %v6033_v37  ;;  %v6115_v37 = vld [vmem:[%s7758_s3 + $0x440] ss:$16 sps:$4 sm:$0xff]  }
 0x5ac   :  { %4998 = vmatmul.mubr.msk.bf16.gmra.mrb[28].mxu1 %vm2144_vm15, %v7021_v9 }
 0x5ad   :  { %3035 = vmatpush1.bf16.msra.mxu1 %v6031_v31  ;;  %3062 = vmatprep.mubr.bf16.mxu1 %v6200_v0  ;;  %v6118_v31 = vld [vmem:[%s7758_s3 + $0x460] ss:$16 sps:$4 sm:$0xff]  }
 0x5ae   :  { %3036 = vmatprep.subr.bf16.mxu1 %v6036_v38  ;;  %v6123_v38 = vld [vmem:[%s7758_s3 + $0x40c] ss:$16 sps:$4 sm:$0xff]  }
 0x5b1   :  { %3037 = vmatpush1.bf16.msra.mxu1 %v6034_v39  ;;  %v6121_v39 = vld [vmem:[%s7758_s3 + $0x408] ss:$16 sps:$4 sm:$0xff]  }
 0x5b2   :  { %3190 = vmatprep.subr.bf16.mxu1 %v6039_v27  ;;  %v6124_v27 = vld [vmem:[%s7758_s3 + $0x428] ss:$16 sps:$4 sm:$0xff]  }
 0x5b4   :  { %4999 = vmatmul.mubr.msk.bf16.vlgmr.msra.gmra.mrb[32].mxu1 %vm2144_vm15, %v6985_v33  ;;  %v6048_v33 = vld [vmem:[%s7758_s3 + $0x2e4] ss:$16 sps:$4 sm:$0xff]  }
 0x5b5   :  { %3191 = vmatpush1.bf16.msra.mxu1 %v6037_v28  ;;  %3072 = vmatprep.mubr.bf16.mxu1 %v6200_v0  ;;  %v6129_v28 = vld [vmem:[%s7758_s3 + $0x44c] ss:$16 sps:$4 sm:$0xff]  }
 0x5b6   :  { %3192 = vmatprep.subr.bf16.mxu1 %v6042_v1  ;;  %v6127_v1 = vld [vmem:[%s7758_s3 + $0x448] ss:$16 sps:$4 sm:$0xff]  }
 0x5b9   :  { %3193 = vmatpush1.bf16.msra.mxu1 %v6040_v41  ;;  %v6132_v41 = vld [vmem:[%s7758_s3 + $0x46c] ss:$16 sps:$4 sm:$0xff]  }
 0x5ba   :  { %3194 = vmatprep.subr.bf16.mxu1 %v6045_v44  ;;  %v6130_v44 = vld [vmem:[%s7758_s3 + $0x468] ss:$16 sps:$4 sm:$0xff]  }
 0x5bc   :  { %5000 = vmatmul.mubr.msk.bf16.gmra.mrb[36].mxu1 %vm2144_vm15, %v7021_v9  ;;  %v6054_v9 = vld [vmem:[%s7758_s3 + $0x2ac] ss:$16 sps:$4 sm:$0xff]  }
 0x5bd   :  { %3195 = vmatpush1.bf16.msra.mxu1 %v6043_v30  ;;  %3222 = vmatprep.mubr.bf16.mxu1 %v6200_v0  ;;  %v6133_v30 = vld [vmem:[%s7765_s10 + $0x40] sm:$0xff]  }
 0x5be   :  { %3196 = vmatprep.subr.bf16.mxu1 %v6048_v33  ;;  %v6134_v33 = vld [vmem:[%s7765_s10] sm:$0xff]   ;;  %5223 = vmatprep.subr.bf16.mxu0 %v6133_v30 }
 0x5bf   :  { %5224 = vmatpush3.bf16.msra.mxu0 %v6134_v33 }
 0x5c1   :  { %3197 = vmatpush1.bf16.msra.mxu1 %v6046_v45  ;;  %v6135_v45 = vld [vmem:[%s7765_s10 + $0x48] sm:$0xff]  }
 0x5c2   :  { %3243 = vmatprep.subr.bf16.mxu1 %v6051_v49  ;;  %5225 = vmatprep.subr.bf16.mxu0 %v6135_v45  ;;  %v6138_v49 = vld [vmem:[%s7765_s10 + $0x10] sm:$0xff]  }
 0x5c4   :  { %5017 = vmatmul.mubr.msk.bf16.vlgmr.msra.gmra.mrb[24].mxu1 %vm2144_vm15, %v6967_v7 }
 0x5c5   :  { %3244 = vmatpush1.bf16.msra.mxu1 %v6049_v46  ;;  %3232 = vmatprep.mubr.bf16.mxu1 %v6200_v0  ;;  %v6140_v46 = vld [vmem:[%s7765_s10 + $0x58] sm:$0xff]  }
 0x5c6   :  { %3245 = vmatprep.subr.bf16.mxu1 %v6054_v9  ;;  %v6142_v9 = vld [vmem:[%s7765_s10 + $0x18] sm:$0xff]  }
 0x5c9   :  { %3246 = vmatpush1.bf16.msra.mxu1 %v6052_v42  ;;  %v6144_v42 = vld [vmem:[%s7765_s10 + $0x60] sm:$0xff]  }
 0x5ca   :  { %3247 = vmatprep.subr.bf16.mxu1 %v6057_v59  ;;  %v6146_v59 = vld [vmem:[%s7765_s10 + $0x20] sm:$0xff]  }
 0x5cc   :  { %5018 = vmatmul.mubr.msk.bf16.gmra.mrb[28].mxu1 %vm2144_vm15, %v7003_v62 }
 0x5cd   :  { %3248 = vmatpush1.bf16.msra.mxu1 %v6055_v52  ;;  %3275 = vmatprep.mubr.bf16.mxu1 %v6200_v0  ;;  %v6148_v52 = vld [vmem:[%s7765_s10 + $0x68] sm:$0xff]  }
 0x5ce   :  { %3249 = vmatprep.subr.bf16.mxu1 %v6060_v13  ;;  %v6150_v13 = vld [vmem:[%s7765_s10 + $0x28] sm:$0xff]  }
 0x5d1   :  { %3250 = vmatpush1.bf16.msra.mxu1 %v6058_v56  ;;  %v6152_v56 = vld [vmem:[%s7765_s10 + $0x70] sm:$0xff]  }
 0x5d2   :  { %3403 = vmatprep.subr.bf16.mxu1 %v6063_v14  ;;  %v6154_v14 = vld [vmem:[%s7765_s10 + $0x30] sm:$0xff]  }
 0x5d4   :  { %5019 = vmatmul.mubr.msk.bf16.vlgmr.msra.gmra.mrb[32].mxu1 %vm2144_vm15, %v6967_v7  ;;  %v6072_v7 = vld [vmem:[%s7758_s3 + $0x364] ss:$16 sps:$4 sm:$0xff]  }
 0x5d5   :  { %3404 = vmatpush1.bf16.msra.mxu1 %v6061_v54  ;;  %3285 = vmatprep.mubr.bf16.mxu1 %v6200_v0  ;;  %v4112_v54 = vlaneseq }
 0x5d6   :  { %3405 = vmatprep.subr.bf16.mxu1 %v6066_v20 }
 0x5d9   :  { %3406 = vmatpush1.bf16.msra.mxu1 %v6064_v22 }
 0x5da   :  { %3407 = vmatprep.subr.bf16.mxu1 %v6069_v4 }
 0x5dc   :  { %5020 = vmatmul.mubr.msk.bf16.gmra.mrb[36].mxu1 %vm2144_vm15, %v7003_v62  ;;  %v6078_v62 = vld [vmem:[%s7758_s3 + $0x32c] ss:$16 sps:$4 sm:$0xff]  }
 0x5dd   :  { %3408 = vmatpush1.bf16.msra.mxu1 %v6067_v19  ;;  %3435 = vmatprep.mubr.bf16.mxu1 %v6200_v0 }
 0x5de   :  { %3409 = vmatprep.subr.bf16.mxu1 %v6072_v7 }
 0x5e1   :  { %3410 = vmatpush1.bf16.msra.mxu1 %v6070_v35 }
 0x5e2   :  { %3456 = vmatprep.subr.bf16.mxu1 %v6075_v53  ;;  %v7549_v53 = vshrl.u32 %v4112_v54, 7 }
 0x5e4   :  { %5037 = vmatmul.mubr.msk.bf16.vlgmr.msra.gmra.mrb[24].mxu1 %vm2144_vm15, %v6970_v6  ;;  %v4126_v30 = vsub.s32 3, %v7549_v53 }
 0x5e5   :  { %3457 = vmatpush1.bf16.msra.mxu1 %v6073_v26  ;;  %3445 = vmatprep.mubr.bf16.mxu1 %v6200_v0 }
 0x5e6   :  { %3458 = vmatprep.subr.bf16.mxu1 %v6078_v62 }
 0x5e9   :  { %3459 = vmatpush1.bf16.msra.mxu1 %v6076_v55 }
 0x5ea   :  { %3460 = vmatprep.subr.bf16.mxu1 %v6081_v43 }
 0x5ec   :  { %5038 = vmatmul.mubr.msk.bf16.gmra.mrb[28].mxu1 %vm2144_vm15, %v7006_v2 }
 0x5ed   :  { %3461 = vmatpush1.bf16.msra.mxu1 %v6079_v32  ;;  %3488 = vmatprep.mubr.bf16.mxu1 %v6200_v0 }
 0x5ee   :  { %3462 = vmatprep.subr.bf16.mxu1 %v6084_v17 }
 0x5f1   :  { %3463 = vmatpush1.bf16.msra.mxu1 %v6082_v58  ;;  %v4114_v58 = vsub.s32 0, %v7549_v53 }
 0x5f2   :  { %3623 = vmatprep.subr.bf16.mxu1 %v6087_v18  ;;  %v4118_v18 = vsub.s32 1, %v7549_v53 }
 0x5f4   :  { %5039 = vmatmul.mubr.msk.bf16.vlgmr.msra.gmra.mrb[32].mxu1 %vm2144_vm15, %v6970_v6  ;;  %v6096_v6 = vld [vmem:[%s7758_s3 + $0x3e4] ss:$16 sps:$4 sm:$0xff]  }
 0x5f5   :  { %3624 = vmatpush1.bf16.msra.mxu1 %v6085_v60  ;;  %3498 = vmatprep.mubr.bf16.mxu1 %v6200_v0 }
 0x5f6   :  { %3625 = vmatprep.subr.bf16.mxu1 %v6090_v21  ;;  %v2043_v21 = vld [vmem:[%s7761_s6] sm:$0xf] }
 0x5f9   :  { %3626 = vmatpush1.bf16.msra.mxu1 %v6088_v40  ;;  %v4122_v40 = vsub.s32 2, %v7549_v53 }
 0x5fa   :  { %3627 = vmatprep.subr.bf16.mxu1 %v6093_v50 }
 0x5fc   :  { %5040 = vmatmul.mubr.msk.bf16.gmra.mrb[36].mxu1 %vm2144_vm15, %v7006_v2  ;;  %v6102_v2 = vld [vmem:[%s7758_s3 + $0x3ac] ss:$16 sps:$4 sm:$0xff]  }
 0x5fd   :  { %3628 = vmatpush1.bf16.msra.mxu1 %v6091_v57  ;;  %3655 = vmatprep.mubr.bf16.mxu1 %v6200_v0 }
 0x5fe   :  { %3629 = vmatprep.subr.bf16.mxu1 %v6096_v6 }
 0x601   :  { %3630 = vmatpush1.bf16.msra.mxu1 %v6094_v61 }
 0x602   :  { %3676 = vmatprep.subr.bf16.mxu1 %v6099_v48 }
 0x604   :  { %5057 = vmatmul.mubr.msk.bf16.vlgmr.msra.gmra.mrb[24].mxu1 %vm2144_vm15, %v6988_v24 }
 0x605   :  { %3677 = vmatpush1.bf16.msra.mxu1 %v6097_v8  ;;  %3665 = vmatprep.mubr.bf16.mxu1 %v6200_v0 }
 0x606   :  { %3678 = vmatprep.subr.bf16.mxu1 %v6102_v2  ;;  %v7564_v2 = vrot.slane %v2043_v21, %v4114_v58 }
 0x609   :  { %3679 = vmatpush1.bf16.msra.mxu1 %v6100_v11 }
 0x60a   :  { %3680 = vmatprep.subr.bf16.mxu1 %v6105_v47  ;;  %v7566_v47 = vrot.slane %v2043_v21, %v4118_v18 }
 0x60c   :  { %5058 = vmatmul.mubr.msk.bf16.gmra.mrb[28].mxu1 %vm2144_vm15, %v7024_v10 }
 0x60d   :  { %3681 = vmatpush1.bf16.msra.mxu1 %v6103_v15  ;;  %3708 = vmatprep.mubr.bf16.mxu1 %v6200_v0 }
 0x60e   :  { %3682 = vmatprep.subr.bf16.mxu1 %v6108_v3 }
 0x611   :  { %3683 = vmatpush1.bf16.msra.mxu1 %v6106_v63 }
 0x612   :  { %3837 = vmatprep.subr.bf16.mxu1 %v6111_v25  ;;  %v7571_v25 = vrot.slane %v2043_v21, %v4122_v40 }
 0x614   :  { %5059 = vmatmul.mubr.msk.bf16.vlgmr.msra.gmra.mrb[32].mxu1 %vm2144_vm15, %v6988_v24  ;;  %v6120_v24 = vld [vmem:[%s7758_s3 + $0x464] ss:$16 sps:$4 sm:$0xff]  }
 0x615   :  { %3838 = vmatpush1.bf16.msra.mxu1 %v6109_v29  ;;  %3718 = vmatprep.mubr.bf16.mxu1 %v6200_v0 }
 0x616   :  { %3839 = vmatprep.subr.bf16.mxu1 %v6114_v34 }
 0x619   :  { %3840 = vmatpush1.bf16.msra.mxu1 %v6112_v12 }
 0x61a   :  { %3841 = vmatprep.subr.bf16.mxu1 %v6117_v36 }
 0x61c   :  { %5060 = vmatmul.mubr.msk.bf16.gmra.mrb[36].mxu1 %vm2144_vm15, %v7024_v10  ;;  %v6126_v10 = vld [vmem:[%s7758_s3 + $0x42c] ss:$16 sps:$4 sm:$0xff]  }
 0x61d   :  { %3842 = vmatpush1.bf16.msra.mxu1 %v6115_v37  ;;  %3869 = vmatprep.mubr.bf16.mxu1 %v6200_v0 }
 0x61e   :  { %3843 = vmatprep.subr.bf16.mxu1 %v6120_v24 }
 0x621   :  { %3844 = vmatpush1.bf16.msra.mxu1 %v6118_v31 }
 0x622   :  { %3890 = vmatprep.subr.bf16.mxu1 %v6123_v38 }
 0x624   :  { %5077 = vmatmul.mubr.msk.bf16.vlgmr.msra.gmra.mrb[24].mxu1 %vm2144_vm15, %v6974_v23 }
 0x625   :  { %3891 = vmatpush1.bf16.msra.mxu1 %v6121_v39  ;;  %3879 = vmatprep.mubr.bf16.mxu1 %v6200_v0 }
 0x626   :  { %3892 = vmatprep.subr.bf16.mxu1 %v6126_v10 }
 0x629   :  { %3893 = vmatpush1.bf16.msra.mxu1 %v6124_v27 }
 0x62a   :  { %3894 = vmatprep.subr.bf16.mxu1 %v6129_v28 }
 0x62c   :  { %5078 = vmatmul.mubr.msk.bf16.gmra.mrb[28].mxu1 %vm2144_vm15, %v7010_v51 }
 0x62d   :  { %3895 = vmatpush1.bf16.msra.mxu1 %v6127_v1  ;;  %3922 = vmatprep.mubr.bf16.mxu1 %v6200_v0 }
 0x62e   :  { %3896 = vmatprep.subr.bf16.mxu1 %v6132_v41 }
 0x631   :  { %3897 = vmatpush1.bf16.msra.mxu1 %v6130_v44 }
 0x634   :  { %5079 = vmatmul.mubr.msk.bf16.vlgmr.msra.gmra.mrb[32].mxu1 %vm2144_vm15, %v6974_v23  ;;  %v6136_v23 = vld [vmem:[%s7765_s10 + $0x8] sm:$0xff]  }
 0x635   :  { %3932 = vmatprep.mubr.bf16.mxu1 %v6200_v0  ;;  %5226 = vmatpush3.bf16.msra.mxu0 %v6136_v23 }
 0x63c   :  { %5080 = vmatmul.mubr.msk.bf16.gmra.mrb[36].mxu1 %vm2144_vm15, %v7010_v51  ;;  %v6137_v51 = vld [vmem:[%s7765_s10 + $0x50] sm:$0xff]  }
 0x63d   :  { %4220 = vmatprep.mubr.bf16.mxu1 %v6200_v0  ;;  %5227 = vmatprep.subr.bf16.mxu0 %v6137_v51 }
 0x63e   :  { %5228 = vmatpush3.bf16.msra.mxu0 %v6138_v49 }
 0x63f   :  { %5229 = vmatprep.subr.bf16.mxu0 %v6140_v46 }
 0x642   :  { %5230 = vmatpush3.bf16.msra.mxu0 %v6142_v9 }
 0x643   :  { %5231 = vmatprep.subr.bf16.mxu0 %v6144_v42 }
 0x646   :  { %5232 = vmatpush3.bf16.msra.mxu0 %v6146_v59 }
 0x647   :  { %5233 = vmatprep.subr.bf16.mxu0 %v6148_v52 }
 0x64a   :  { %5234 = vmatpush3.bf16.msra.mxu0 %v6150_v13 }
 0x64b   :  { %5235 = vmatprep.subr.bf16.mxu0 %v6152_v56 }
 0x64e   :  { %5236 = vmatpush3.bf16.msra.mxu0 %v6154_v14 }
 0x6f7   :  { %v3871_v20 = vpop.f32.mrb[24].mxu1 }
 0x6f8   :  { %v3873_v22 = vpop.f32.mrb[25].mxu1  ;;  %v3975_v19 = vrot.slane %v3871_v20, 1 }
 0x6f9   :  { %v3875_v4 = vpop.f32.mrb[26].mxu1  ;;  %v3978_v26 = vrot.slane %v3873_v22, 1 }
 0x6fa   :  { %v3976_v7 = vrot.slane %v3875_v4, 1  ;;  %v3877_v35 = vpop.f32.mrb[27].mxu1 }
 0x6fb   :  { %v3979_v62 = vrot.slane %v3877_v35, 1 }
 0x6fc   :  { %v3977_v55 = vsel %vm271_vm4, %v3975_v19, %v3976_v7 }
 0x6fd   :  { %v7552_v43 = vmax.f32 %v3871_v20, %v3977_v55  ;;  %v3980_v32 = vsel %vm271_vm4, %v3978_v26, %v3979_v62 }
 0x6fe   :  { %v7555_v17 = vmax.f32 %v3873_v22, %v3980_v32 }
 0x6ff   :  { %v3881_v60 = vpop.f32.mrb[28].mxu1  ;;  %v4051_v29 = vrot.slane %v7552_v43, 4 }
 0x700   :  { %v3987_v50 = vrot.slane %v3881_v60, 1  ;;  %v3883_v57 = vpop.f32.mrb[29].mxu1  ;;  %v4054_v39 = vrot.slane %v7555_v17, 4 }
 0x701   :  { %v3989_v6 = vrot.slane %v3883_v57, 1  ;;  %v3885_v61 = vpop.f32.mrb[30].mxu1 }
 0x702   :  { %v3988_v48 = vsel %vm271_vm4, %v3976_v7, %v3987_v50  ;;  %v3995_v8 = vrot.slane %v3885_v61, 1  ;;  %v3887_v11 = vpop.f32.mrb[31].mxu1 }
 0x703   :  { %v7568_v15 = vmax.f32 %v3875_v4, %v3988_v48  ;;  %v3990_v3 = vsel %vm271_vm4, %v3979_v62, %v3989_v6  ;;  %v3997_v63 = vrot.slane %v3887_v11, 1  ;;  %v7591_v62 = vrot.slane %v2043_v21, %v4126_v30 }
 0x704   :  { %v4024_v34 = vmax.f32 %v3877_v35, %v3990_v3  ;;  %v3996_v12 = vsel %vm271_vm4, %v3987_v50, %v3995_v8  ;;  %v4031_v36 = vmax.f32 %v3885_v61, %v3995_v8 }
 0x705   :  { %v4052_v37 = vrot.slane %v7568_v15, 4  ;;  %v4027_v24 = vmax.f32 %v3881_v60, %v3996_v12  ;;  %v3998_v31 = vsel %vm271_vm4, %v3989_v6, %v3997_v63  ;;  %v4032_v38 = vmax.f32 %v3887_v11, %v3997_v63 }
 0x706   :  { %v4055_v10 = vrot.slane %v4024_v34, 4  ;;  %v4071_v27 = vrot.slane %v4031_v36, 4  ;;  %v4028_v28 = vmax.f32 %v3883_v57, %v3998_v31 }
 0x707   :  { %v4063_v1 = vrot.slane %v4027_v24, 4  ;;  %v4073_v41 = vrot.slane %v4032_v38, 4  ;;  %v3924_v44 = vpop.f32.mrb[32].mxu1  ;;  %v4053_v33 = vsel %vm456_vm6, %v4051_v29, %v4052_v37 }
 0x708   :  { %v4107_v45 = vmax.f32 %v4031_v36, %v4071_v27  ;;  %v4065_v23 = vrot.slane %v4028_v28, 4  ;;  %v3981_v51 = vrot.slane %v3924_v44, 1  ;;  %v3926_v49 = vpop.f32.mrb[33].mxu1  ;;  %v4056_v46 = vsel %vm456_vm6, %v4054_v39, %v4055_v10 }
 0x709   :  { %v4072_v9 = vsel %vm456_vm6, %v4063_v1, %v4071_v27  ;;  %v4108_v42 = vmax.f32 %v4032_v38, %v4073_v41  ;;  %v3984_v59 = vrot.slane %v3926_v49, 1  ;;  %v3928_v52 = vpop.f32.mrb[34].mxu1  ;;  %v4096_v13 = vmax.f32 %v7555_v17, %v4056_v46 }
 0x70a   :  { %v4103_v56 = vmax.f32 %v4027_v24, %v4072_v9  ;;  %v4144_v14 = vadd.f32 %v7564_v2, %v4107_v45  ;;  %v4074_v54 = vsel %vm456_vm6, %v4065_v23, %v4073_v41  ;;  %v3982_v20 = vrot.slane %v3928_v52, 1  ;;  %v3930_v22 = vpop.f32.mrb[35].mxu1 }
 0x70b   :  { %v4104_v4 = vmax.f32 %v4028_v28, %v4074_v54  ;;  %v7586_v19 = vadd.f32 %v7566_v47, %v4108_v42  ;;  %v3985_v7 = vrot.slane %v3930_v22, 1  ;;  %v4066_v35 = vsel %vm456_vm6, %v4055_v10, %v4065_v23 }
 0x70c   :  { %v4140_v53 = vadd.f32 %v7564_v2, %v4103_v56  ;;  %v3983_v26 = vsel %vm271_vm4, %v3981_v51, %v3982_v20  ;;  %v4100_v55 = vmax.f32 %v4024_v34, %v4066_v35  ;;  %v4160_v32 = vmax.f32 %v4144_v14, 0.0 }
 0x70d   :  { %v7593_v17 = vmax.f32 %v3924_v44, %v3983_v26  ;;  %v3986_v58 = vsel %vm271_vm4, %v3984_v59, %v3985_v7  ;;  %v4133_v18 = vadd.f32 %v7566_v47, %v4096_v13  ;;  %v4064_v57 = vsel %vm456_vm6, %v4052_v37, %v4063_v1 }
 0x70e   :  { %v4156_v60 = vmax.f32 %v4140_v53, 0.0  ;;  %v7597_v40 = vmax.f32 %v3926_v49, %v3986_v58  ;;  %v4137_v50 = vadd.f32 %v7566_v47, %v4100_v55  ;;  %v4161_v6 = vmax.f32 %v7586_v19, 0.0 }
 0x70f   :  { %v4057_v21 = vrot.slane %v7593_v17, 4  ;;  %v3934_v61 = vpop.f32.mrb[36].mxu1  ;;  %v4095_v48 = vmax.f32 %v7552_v43, %v4053_v33  ;;  %v4099_v8 = vmax.f32 %v7568_v15, %v4064_v57  ;;  %v4149_v29 = vmax.f32 %v4133_v18, 0.0 }
 0x710   :  { %v7605_v11 = vpack.c.bf16 %v4160_v32, %v4156_v60  ;;  %v3991_v3 = vrot.slane %v3934_v61, 1  ;;  %v3936_v63 = vpop.f32.mrb[37].mxu1  ;;  %v4153_v34 = vmax.f32 %v4137_v50, 0.0  ;;  %v4060_v12 = vrot.slane %v7597_v40, 4 }
 0x711   :  { %v3993_v36 = vrot.slane %v3936_v63, 1  ;;  %v3938_v24 = vpop.f32.mrb[38].mxu1  ;;  %v4132_v37 = vadd.f32 %v7564_v2, %v4095_v48  ;;  %v4136_v31 = vadd.f32 %v7564_v2, %v4099_v8  ;;  %v4141_v15 = vadd.f32 %v7566_v47, %v4104_v4 }
 0x712   :  { %v3992_v38 = vsel %vm271_vm4, %v3982_v20, %v3991_v3  ;;  %v3999_v39 = vrot.slane %v3938_v24, 1  ;;  %v3940_v43 = vpop.f32.mrb[39].mxu1  ;;  %v4165_v10 = vpack.c.bf16 %v4153_v34, %v4149_v29  ;;  %v4177_v60 = vand.u32 %v7605_v11, %v6299_v5  ;;  %v4172_v11 = vld [vmem:[%s7764_s9] sm:$0x1] }
 0x713   :  { %v4025_v27 = vmax.f32 %v3928_v52, %v3992_v38  ;;  %v3994_v28 = vsel %vm271_vm4, %v3985_v7, %v3993_v36  ;;  %v4001_v1 = vrot.slane %v3940_v43, 1  ;;  %v4148_v41 = vmax.f32 %v4132_v37, 0.0 }
 0x714   :  { %v4026_v44 = vmax.f32 %v3930_v22, %v3994_v28  ;;  %v4000_v30 = vsel %vm271_vm4, %v3991_v3, %v3999_v39  ;;  %v4033_v33 = vmax.f32 %v3938_v24, %v3999_v39  ;;  %4188 = vmatprep.subr.bf16.mxu1 %v4165_v10  ;;  %v4152_v45 = vmax.f32 %v4136_v31, 0.0  ;;  %v6145_v28 = vld [vmem:[%s7765_s10 + $0x88] sm:$0xff]  }
 0x715   :  { %v4058_v23 = vrot.slane %v4025_v27, 4  ;;  %v4029_v2 = vmax.f32 %v3934_v61, %v4000_v30  ;;  %v4002_v51 = vsel %vm271_vm4, %v3993_v36, %v4001_v1  ;;  %v4034_v49 = vmax.f32 %v3940_v43, %v4001_v1  ;;  %v6149_v1 = vld [vmem:[%s7765_s10 + $0x90] sm:$0xff]   ;;  %v6155_v30 = vld [vmem:[%s7765_s10 + $0xe0] sm:$0xff]  }
 0x716   :  { %v4061_v46 = vrot.slane %v4026_v44, 4  ;;  %v4075_v9 = vrot.slane %v4033_v33, 4  ;;  %v4030_v42 = vmax.f32 %v3936_v63, %v4002_v51  ;;  %v4164_v47 = vpack.c.bf16 %v4152_v45, %v4148_v41  ;;  %v6151_v41 = vld [vmem:[%s7765_s10 + $0xd8] sm:$0xff]   ;;  %v6157_v45 = vld [vmem:[%s7765_s10 + $0xa0] sm:$0xff]   ;;  %v6160_v51 = vld [vmem:[%s7765_s10 + $0xa8] sm:$0xff]  }
 0x717   :  { %v4067_v59 = vrot.slane %v4029_v2, 4  ;;  %v4077_v52 = vrot.slane %v4034_v49, 4  ;;  %v4157_v13 = vmax.f32 %v4141_v15, 0.0  ;;  %v4059_v56 = vsel %vm456_vm6, %v4057_v21, %v4058_v23 }
 0x718   :  { %v4109_v14 = vmax.f32 %v4033_v33, %v4075_v9  ;;  %v4069_v54 = vrot.slane %v4030_v42, 4  ;;  %4189 = vmatpush1.bf16.msra.mxu1 %v4164_v47  ;;  %v4062_v20 = vsel %vm456_vm6, %v4060_v12, %v4061_v46  ;;  %v4097_v22 = vmax.f32 %v7593_v17, %v4059_v56  ;;  %v6156_v33 = vld [vmem:[%s7765_s10 + $0x78] sm:$0xff]  }
 0x719   :  { %v4076_v4 = vsel %vm456_vm6, %v4067_v59, %v4075_v9  ;;  %v4110_v19 = vmax.f32 %v4034_v49, %v4077_v52  ;;  %v4169_v7 = vpack.c.bf16 %v4161_v6, %v4157_v13  ;;  %v4098_v35 = vmax.f32 %v7597_v40, %v4062_v20  ;;  %5237 = vmatprep.subr.bf16.mxu0 %v6156_v33  ;;  %v6161_v49 = vld [vmem:[%s7765_s10 + $0xf0] sm:$0xff]   ;;  %v6163_v9 = vld [vmem:[%s7765_s10 + $0xf8] sm:$0xff]  }
 0x71a   :  { %v4105_v53 = vmax.f32 %v4029_v2, %v4076_v4  ;;  %v4146_v26 = vadd.f32 %v7571_v25, %v4109_v14  ;;  %v4078_v55 = vsel %vm456_vm6, %v4069_v54, %v4077_v52  ;;  %v4070_v32 = vsel %vm456_vm6, %v4061_v46, %v4069_v54  ;;  %v6159_v2 = vld [vmem:[%s7765_s10 + $0xe8] sm:$0xff]   ;;  %v6162_v46 = vld [vmem:[%s7765_s10 + $0xb0] sm:$0xff]  }
 0x71b   :  { %v4106_v58 = vmax.f32 %v4030_v42, %v4078_v55  ;;  %v4180_v18 = vand.u32 %v4169_v7, %v6299_v5  ;;  %v4102_v17 = vmax.f32 %v4026_v44, %v4070_v32  ;;  %v4147_v57 = vadd.f32 %v7591_v62, %v4110_v19  ;;  %v6153_v44 = vld [vmem:[%s7765_s10 + $0x98] sm:$0xff]   ;;  %v6169_v32 = vld [vmem:[%s7767_s12] sm:$0xff]  }
 0x71c   :  { %v4142_v50 = vadd.f32 %v7571_v25, %v4105_v53  ;;  %v4135_v40 = vadd.f32 %v7591_v62, %v4098_v35  ;;  %v4068_v6 = vsel %vm456_vm6, %v4058_v23, %v4067_v59  ;;  %v4134_v48 = vadd.f32 %v7571_v25, %v4097_v22  ;;  %v6158_v23 = vld [vmem:[%s7765_s10 + $0x38] sm:$0xff]   ;;  %v6165_v35 = vld [vmem:[%s7766_s11] sm:$0xff]   ;;  %v6166_v53 = vld [vmem:[%s7766_s11 + $0x8] sm:$0xff]  }
 0x71d   :  { %4190 = vmatprep.subr.bf16.mxu1 %v4180_v18  ;;  %v4139_v21 = vadd.f32 %v7591_v62, %v4102_v17  ;;  %v4101_v61 = vmax.f32 %v4025_v27, %v4068_v6  ;;  %v4162_v3 = vmax.f32 %v4146_v26, 0.0  ;;  %v4143_v63 = vadd.f32 %v7591_v62, %v4106_v58  ;;  %v6141_v27 = vld [vmem:[%s7765_s10 + $0x80] sm:$0xff]   ;;  %5238 = vmatpush3.bf16.msra.mxu0 %v6158_v23  ;;  %v6164_v42 = vld [vmem:[%s7765_s10 + $0xb8] sm:$0xff]   ;;  %v6167_v26 = vld [vmem:[%s7766_s11 + $0x10] sm:$0xff]  }
 0x71e   :  { %v4158_v8 = vmax.f32 %v4142_v50, 0.0  ;;  %4191 = vmatpush1.bf16.msra.mxu1 %v4177_v60  ;;  %v4151_v29 = vmax.f32 %v4135_v40, 0.0  ;;  %v4163_v24 = vmax.f32 %v4147_v57, 0.0  ;;  %v4150_v38 = vmax.f32 %v4134_v48, 0.0  ;;  %5563 = vmatprep.subr.bf16.mxu0 %v6198_v16  ;;  %v6168_v55 = vld [vmem:[%s7766_s11 + $0x18] sm:$0xff]   ;;  %v6170_v58 = vld [vmem:[%s7767_s12 + $0x8] sm:$0xff]  }
 0x71f   :  { %v4155_v34 = vmax.f32 %v4139_v21, 0.0  ;;  %v4138_v12 = vadd.f32 %v7571_v25, %v4101_v61  ;;  %v4159_v37 = vmax.f32 %v4143_v63, 0.0  ;;  %v6139_v25 = vld [vmem:[%s7765_s10 + $0xc0] sm:$0xff]  }
 0x720   :  { %v4170_v36 = vpack.c.bf16 %v4162_v3, %v4158_v8  ;;  %v5083_v40 = vld [vmem:[%s7768_s13] ss:$0 sm:$0xff] }
 0x721   :  { %5081 = vmatmul.mubr.msk.bf16.vlgmr.msra.gmra.mrb[40].mxu1 %vm127_vm2, %v4172_v11  ;;  %v4167_v31 = vpack.c.bf16 %v4155_v34, %v4151_v29  ;;  %v4154_v39 = vmax.f32 %v4138_v12, 0.0  ;;  %v4171_v43 = vpack.c.bf16 %v4163_v24, %v4159_v37  ;;  %v6171_v34 = vld [vmem:[%s7767_s12 + $0x10] sm:$0xff]   ;;  %v6172_v12 = vld [vmem:[%s7767_s12 + $0x18] sm:$0xff]   ;;  %s6201_s12 = smov [#allocation2]  }
 0x722   :  { %4261 = vmatprep.mubr.bf16.mxu1 %v6200_v0  ;;  %v4183_v62 = vand.u32 %v4170_v36, %v6299_v5  ;;  %v6143_v0 = vld [vmem:[%s7765_s10 + $0xc8] sm:$0xff]   ;;  %v5116_v36 = vld [vmem:[%s7769_s14] ss:$0 sm:$0xff]  ;;  %s4792_s19 = sshll.u32 %s6201_s12, 4  ;;  %s4793_s19 = int_to_ptr.vmem [resolvable:$true] %s4792_s19 }
 0x723   :  { %4229 = vmatprep.subr.bf16.mxu1 %v4167_v31  ;;  %v4166_v10 = vpack.c.bf16 %v4154_v39, %v4150_v38  ;;  %v4186_v15 = vand.u32 %v4171_v43, %v6299_v5  ;;  %v6147_v5 = vld [vmem:[%s7765_s10 + $0xd0] sm:$0xff]   ;;  %s6173_s14 = scalar_lea.vmem %s4793_s19, 32  ;;  %p6178_p1 = scmp.lt.s32.totalorder %s4793_s19, %s4793_s19 }
 0x724   :  { %p6174_p0 = scmp.ne.s32.totalorder %s4793_s19, %s6173_s14  ;;  %p6179_p2 = scmp.lt.s32.totalorder %s6173_s14, %s6173_s14 }
 0x725   :  { %4230 = vmatpush1.bf16.msra.mxu1 %v4166_v10 }
 0x726   :  { %4231 = vmatprep.subr.bf16.mxu1 %v4186_v15  ;;  %v5122_v15 = vld [vmem:[%s7770_s15] ss:$0 sm:$0xff]  ;;  %p6180_p3 = por %p6179_p2, %p6178_p1 }
 0x728   :  { %p6181_p4 = pnand %p6180_p3, %p6174_p0 }
 0x729   :  { %4232 = vmatpush1.bf16.msra.mxu1 %v4183_v62 }
 0x72a   :  { %5245 = vmatprep.subr.bf16.mxu1 %v6139_v25 }
 0x72c   :  { %5082 = vmatmul.mubr.msk.bf16.vlgmr.msra.gmra.mrb[44].mxu1 %vm127_vm2, %v4172_v11 }
 0x72d   :  { %5246 = vmatpush3.bf16.msra.mxu1 %v6141_v27 }
 0x72e   :  { %5247 = vmatprep.subr.bf16.mxu1 %v6143_v0 }
 0x731   :  { %5248 = vmatpush3.bf16.msra.mxu1 %v6145_v28 }
 0x732   :  { %5249 = vmatprep.subr.bf16.mxu1 %v6147_v5 }
 0x735   :  { %5250 = vmatpush3.bf16.msra.mxu1 %v6149_v1 }
 0x736   :  { %5251 = vmatprep.subr.bf16.mxu1 %v6151_v41 }
 0x739   :  { %5252 = vmatpush3.bf16.msra.mxu1 %v6153_v44 }
 0x73a   :  { %5253 = vmatprep.subr.bf16.mxu1 %v6155_v30 }
 0x73d   :  { %5254 = vmatpush3.bf16.msra.mxu1 %v6157_v45 }
 0x73e   :  { %5255 = vmatprep.subr.bf16.mxu1 %v6159_v2 }
 0x741   :  { %5256 = vmatpush3.bf16.msra.mxu1 %v6160_v51 }
 0x742   :  { %5257 = vmatprep.subr.bf16.mxu1 %v6161_v49 }
 0x745   :  { %5258 = vmatpush3.bf16.msra.mxu1 %v6162_v46 }
 0x746   :  { %5259 = vmatprep.subr.bf16.mxu1 %v6163_v9 }
 0x749   :  { %5260 = vmatpush3.bf16.msra.mxu1 %v6164_v42 }
 0x74a   :  { %5575 = vmatprep.subr.bf16.mxu1 %v6198_v16 }
 0x7f4   :  { %v4222_v47 = vpop.f32.mrb[40].mxu1 }
 0x7f5   :  { %v4270_v59 = vpack.c.bf16 %v4222_v47, %v4222_v47  ;;  %v4224_v52 = vpop.f32.mrb[41].mxu1 }
 0x7f6   :  { %v4271_v13 = vpack.c.bf16 %v4224_v52, %v4224_v52  ;;  %v4226_v56 = vpop.f32.mrb[42].mxu1 }
 0x7f7   :  { %v4227_v14 = vpop.f32.mrb[43].mxu1 }
 0x7f8   :  { %4569 = vmatprep.mubr.bf16.mxu0 %v4271_v13 }
 0x7f9   :  { %4570 = vmatmul.mubr.bf16.vlgmr.msra.gmra.mrb[36].mxu0 %v4270_v59 }
 0x7fa   :  { %5571 = vmatprep.mubr.msk.bf16.mxu0 %vm6199_vm7, %v6198_v16  ;;  %5564 = vmatpush3.bf16.msra.mxu0 %v6165_v35 }
 0x7fb   :  { %5565 = vmatprep.subr.bf16.mxu0 %v6198_v16 }
 0x7fe   :  { %5566 = vmatpush3.bf16.msra.mxu0 %v6166_v53 }
 0x7ff   :  { %v4263_v54 = vpop.f32.mrb[44].mxu1  ;;  %5567 = vmatprep.subr.bf16.mxu0 %v6198_v16 }
 0x800   :  { %v4265_v20 = vpop.f32.mrb[45].mxu1  ;;  %v4272_v19 = vpack.c.bf16 %v4263_v54, %v4263_v54 }
 0x801   :  { %v4273_v22 = vpack.c.bf16 %v4265_v20, %v4265_v20  ;;  %v4267_v4 = vpop.f32.mrb[46].mxu1 }
 0x802   :  { %v4268_v7 = vpop.f32.mrb[47].mxu1  ;;  %5568 = vmatpush3.bf16.msra.mxu0 %v6167_v26 }
 0x803   :  { %4609 = vmatprep.mubr.bf16.mxu1 %v4273_v22  ;;  %5569 = vmatprep.subr.bf16.mxu0 %v6198_v16 }
 0x804   :  { %4610 = vmatmul.mubr.bf16.vlgmr.msra.gmra.mrb[48].mxu1 %v4272_v19 }
 0x805   :  { %5583 = vmatprep.mubr.msk.bf16.mxu1 %vm6199_vm7, %v6198_v16  ;;  %5576 = vmatpush3.bf16.msra.mxu1 %v6169_v32 }
 0x806   :  { %5577 = vmatprep.subr.bf16.mxu1 %v6198_v16  ;;  %5570 = vmatpush3.bf16.msra.mxu0 %v6168_v55 }
 0x809   :  { %5578 = vmatpush3.bf16.msra.mxu1 %v6170_v58 }
 0x80a   :  { %5579 = vmatprep.subr.bf16.mxu1 %v6198_v16 }
 0x80d   :  { %5580 = vmatpush3.bf16.msra.mxu1 %v6171_v34 }
 0x80e   :  { %5581 = vmatprep.subr.bf16.mxu1 %v6198_v16 }
 0x811   :  { %5582 = vmatpush3.bf16.msra.mxu1 %v6172_v12 }
 0x8cc   :  { %v5239_v18 = vpop.f32.mrb[36].mxu0 }
 0x8cd   :  { %v5240_v60 = vpop.f32.mrb[37].mxu0 }
 0x8ce   :  { %v5241_v17 = vadd.f32 %v5240_v60, %v5239_v18  ;;  %v5242_v50 = vpop.f32.mrb[38].mxu0 }
 0x8cf   :  { %v5243_v57 = vpop.f32.mrb[39].mxu0 }
 0x8d0   :  { %v4572_v61 = vadd.f32 %v5241_v17, %v5083_v40 }
 0x8d7   :  { %v5261_v6 = vpop.f32.mrb[48].mxu1 }
 0x8d8   :  { %v5262_v21 = vpop.f32.mrb[49].mxu1 }
 0x8d9   :  { %v5263_v48 = vadd.f32 %v5262_v21, %v5261_v6  ;;  %v5264_v8 = vpop.f32.mrb[50].mxu1 }
 0x8da   :  { %v5265_v3 = vpop.f32.mrb[51].mxu1 }
 0x8db   :  { %v4612_v11 = vadd.f32 %v5263_v48, %v4572_v61 }
 0x8dd   :  { %v4617_v63 = vmax.f32 %v4612_v11, 0.0 }
 0x8df   :  { %v4618_v29 = vpack.c.bf16 %v4617_v63, %v4617_v63 }
 0x8e1   :  { %5572 = vmatmul.mubr.msk.bf16.vlgmr.msra.gmra.mrb[40].mxu0 %vm2144_vm15, %v4618_v29 }
 0x9b4   :  { %v4695_v24 = vpop.f32.mrb[40].mxu0 }
 0x9b5   :  { %v4696_v37 = vadd.f32 %v5116_v36, %v4695_v24  ;;  %v5573_v31 = vpop.f32.mrb[41].mxu0 }
 0x9b6   :  { %v4698_v38 = vpop.f32.mrb[42].mxu0 }
 0x9b7   :  { %v4701_v39 = vmax.f32 %v4696_v37, 0.0  ;;  %v5574_v43 = vpop.f32.mrb[43].mxu0 }
 0x9b9   :  { %v4702_v10 = vpack.c.bf16 %v4701_v39, %v4701_v39 }
 0x9bb   :  { %5584 = vmatmul.mubr.msk.bf16.vlgmr.msra.gmra.mrb[52].mxu1 %vm2144_vm15, %v4702_v10 }
 0xa8e   :  { %v4779_v16 = vpop.f32.mrb[52].mxu1 }
 0xa8f   :  { %v4780_v25 = vadd.f32 %v5122_v15, %v4779_v16  ;;  %v5585_v62 = vpop.f32.mrb[53].mxu1 }
 0xa90   :  { %v4782_v27 = vpop.f32.mrb[54].mxu1 }
 0xa91   :  { %4785 = vst [vmem:[#allocation2] sm:$0x3] %v4780_v25  ;;  %v5586_v0 = vpop.f32.mrb[55].mxu1 }
 0xa92   :  { %6184 = shalt.err (!%p6181_p4)
}
 0xa93   :  { %s6185_s15 = scalar_lea.hbm %s7771_s16, 32 }
 0xa94   :  { %p6186_p5 = scmp.ne.s32.totalorder %s7771_s16, %s6185_s15  ;;  %p6189_p6 = scmp.lt.u32.totalorder %s6185_s15, %s7771_s16 }
 0xa96   :  { %p6191_p7 = pnand %p6189_p6, %p6186_p5 }
 0xa98   :  { %6194 = shalt.err (!%p6191_p7)
}
 0xa99   :  { %4795 = dma.vmem_to_hbm [thread:$0]  %s4793_s19, 32, %s7771_s16, [#allocation3]  }
 0xa9a   :  { %6195 = dma.done.wait [#allocation3], 32  }
 0xa9b   :  { %6196 = vsyncadd [#allocation3], 4294967264 }
 0xa9c   :  { %4799 = vsyncpa [#allocation3], 1 }

</bundles_post_ra>
